<compile_context>
chip_gen: v7x
topology: tpu7x:2x2x1
jax: 0.10.0
libtpu: 0.0.40
codegen_flags: <defaults>
</compile_context>

<pallas_src>
import functools

import jax
import jax.numpy as jnp
from jax import lax
from jax.experimental import pallas as pl
from jax.experimental.pallas import tpu as pltpu

NS_ITERS = 6


def _global_cov_pool_kernel(x_ref, o_ref, g_ref, s_ref, *,
                            n_total, tb, c, precision):
    """One grid step over a (TB*C, TN) spatial tile.

    x_ref: (TB*C, TN)       input tile (channel-major, N on lanes; f32 or bf16)
    o_ref: (TB, 1, C)  f32  output block (written only on the last spatial tile)
    g_ref: (TB*C, TB*C) f32 VMEM scratch -- packed Gram accumulator
    s_ref: (TB*C, 1)   f32  VMEM scratch -- per-(batch,channel) spatial sums
    """
    k = pl.program_id(1)
    nk = pl.num_programs(1)

    @pl.when(k == 0)
    def _init():
        g_ref[...] = jnp.zeros_like(g_ref)
        s_ref[...] = jnp.zeros_like(s_ref)

    x = x_ref[...].astype(jnp.float32)                 # (P, TN), P = TB*C

    # Packed Gram: ONE (P, TN) @ (TN, P) MXU matmul per tile instead of TB tiny
    # (C, TN) @ (TN, C) matmuls -> amortizes MXU weight loads across P columns.
    g_ref[...] += lax.dot_general(
        x, x, dimension_numbers=(((1,), (1,)), ((), ())),
        precision=precision, preferred_element_type=jnp.float32)   # (P, P)
    s_ref[...] += jnp.sum(x, axis=1, keepdims=True)                # (P, 1)

    @pl.when(k == nk - 1)
    def _finalize():
        inv_n = jnp.float32(1.0 / n_total)

        # Extract the TB diagonal (C, C) Gram blocks and (C, 1) sum blocks.
        # Static slices, executed once per batch tile -> negligible cost.
        g_blocks, s_blocks = [], []
        for i in range(tb):
            g_blocks.append(g_ref[pl.ds(i * c, c), pl.ds(i * c, c)])
            s_blocks.append(s_ref[pl.ds(i * c, c), :])
        G = jnp.stack(g_blocks, axis=0)                # (TB, C, C)
        s = jnp.stack(s_blocks, axis=0)                # (TB, C, 1)

        # sigma = X^T M X == (1/n) * (G - (1/n) * s s^T)   (M = centering mat)
        outer = lax.dot_general(                       # rank-1 s s^T, (TB, C, C)
            s, s, dimension_numbers=(((2,), (2,)), ((0,), (0,))),
            precision=precision, preferred_element_type=jnp.float32)
        sigma = inv_n * (G - inv_n * outer)

        rr = lax.broadcasted_iota(jnp.int32, (c, c), 0)
        cc = lax.broadcasted_iota(jnp.int32, (c, c), 1)
        eye_c = (rr == cc).astype(jnp.float32)         # (C, C)
        eye_b = eye_c[None, :, :]                      # (1, C, C) trace mask
        three_eye = jnp.broadcast_to(3.0 * eye_c, (tb, c, c))  # hoisted once

        # Trace normalization.  The reference stores 1/trace into an int64
        # tensor (truncation toward zero) -> jnp.trunc replicates that cast.
        tr = jnp.sum(jnp.sum(sigma * eye_b, axis=2, keepdims=True),
                     axis=1, keepdims=True)            # (TB, 1, 1)
        sigma = jnp.trunc(1.0 / tr) * sigma

        # Newton-Schulz style iteration, verbatim from the reference:
        #   Y <- (0.5*Y) (*) (3I - Z@Y)      (elementwise (*), as written)
        #   Z <- (0.5*(3I - Z@Y_old)) @ Z
        Y = sigma
        Z = jnp.broadcast_to(eye_c, (tb, c, c))
        for _ in range(NS_ITERS):
            zy = lax.dot_general(
                Z, Y, dimension_numbers=(((2,), (1,)), ((0,), (0,))),
                precision=precision, preferred_element_type=jnp.float32)
            T = three_eye - zy
            Y_new = (0.5 * Y) * T                      # elementwise, per reference
            Z = lax.dot_general(
                0.5 * T, Z, dimension_numbers=(((2,), (1,)), ((0,), (0,))),
                precision=precision, preferred_element_type=jnp.float32)
            Y = Y_new

        # Second int64-truncated scale: trunc(sqrt(trace(Y))).
        tr_y = jnp.sum(jnp.sum(Y * eye_b, axis=2, keepdims=True),
                       axis=1, keepdims=True)          # (TB, 1, 1)
        y_hat = jnp.trunc(jnp.sqrt(tr_y)) * Y          # (TB, C, C)

        # torch Y_hat.mean(dim=1): mean over rows, keep the column index.
        o_ref[...] = jnp.mean(y_hat, axis=1, keepdims=True)   # (TB, 1, C)


def _round_up(x, m):
    return ((x + m - 1) // m) * m


def _pick_batch_tile(b, c, pack_width, keep_two_batch_steps):
    """Largest divisor tb of b with tb*c <= pack_width, tb*c a multiple of 8
    (BlockSpec second-minor rule) or the full b*c, and -- on small-VMEM
    (v7x-like) parts -- b // tb >= 2 so the "parallel" batch axis can shard
    across both TensorCores."""
    cap = max(1, pack_width // max(c, 1))

    def ok(t, need_two):
        if b % t != 0:
            return False
        if need_two and b >= 2 and b // t < 2:
            return False
        return (t * c) % 8 == 0 or t * c == b * c

    for need_two in ((True, False) if keep_two_batch_steps else (False,)):
        best = 0
        for t in range(1, min(b, cap) + 1):
            if ok(t, need_two):
                best = t
        if best:
            return best
    return b   # full-batch fallback: block first dim == full array dim


def _pick_spatial_tile(n, cap):
    """Return (tn, n_pad): a 128-multiple spatial tile and the (possibly padded)
    spatial extent.  Prefers an exact 128-multiple divisor of n (no pad copy)."""
    cap = max(128, (cap // 128) * 128)
    if n <= cap:
        tn = _round_up(n, 128)
        return tn, tn
    best = 0
    t = 128
    while t <= cap:
        if n % t == 0:
            best = t
        t += 128
    if best >= 512:          # review: >=512-wide runs for DMA efficiency
        return best, n
    return cap, _round_up(n, cap)


def global_cov_pooling(x, *, tb=None, tn=None, pack_width=128,
                       matmul_precision=lax.Precision.HIGHEST):
    """x: (B, C, H, W) float (NCHW, as in PyTorch). Returns (B, C, 1, 1) f32."""
    b, c, h, w = x.shape
    n = h * w

    # Stream the input in its own dtype (bf16 stays bf16 -> half the HBM bytes);
    # the kernel upcasts per tile.  Other dtypes fall back to f32.
    if x.dtype not in (jnp.float32, jnp.bfloat16):
        x = x.astype(jnp.float32)
    itemsize = jnp.dtype(x.dtype).itemsize

    # Generation-aware budgets (v5e/v6e: 128 MiB VMEM; v7x: 64 MiB per TC).
    try:
        vmem_cap = int(getattr(pltpu.get_tpu_info(), "vmem_capacity_bytes",
                               64 << 20))
    except Exception:
        vmem_cap = 64 << 20      # conservative default (v7x-like)
    big_vmem = vmem_cap >= (96 << 20)
    in_budget = (24 << 20) if big_vmem else (12 << 20)  # double-buffered inputs

    if tb is None:
        tb = _pick_batch_tile(b, c, pack_width,
                              keep_two_batch_steps=not big_vmem)
    assert b % tb == 0, (b, tb)
    assert (tb * c) % 8 == 0 or tb == b, (tb, c)
    p = tb * c                                          # packed rows per step

    if tn is None:
        cap = min(8192, max(128, in_budget // (2 * p * itemsize)))
        tn, n_pad = _pick_spatial_tile(n, cap)
    else:
        assert tn % 128 == 0 or tn == n, tn
        n_pad = _round_up(n, tn)

    # Channel-major, lane-dense layout: (B, C, H, W) -> (B*C, N_pad).  The
    # reshapes are free (contiguous); only non-tileable N pays one pad copy.
    x2d = x.reshape(b, c, n)
    if n_pad != n:
        # Zeros contribute nothing to the Gram or the channel sums; 1/n below
        # still uses the true n, so the math is unchanged.
        x2d = jnp.pad(x2d, ((0, 0), (0, 0), (0, n_pad - n)))
    x2d = x2d.reshape(b * c, n_pad)

    # Explicit VMEM budget derived from the actual working set.
    work_set = (2 * p * tn * itemsize        # double-buffered input tiles
                + p * p * 4                  # packed Gram accumulator
                + p * 128 * 4                # channel-sum scratch (lane-padded)
                + 4 * p * p * 4              # finalize packed temporaries
                + 10 * tb * c * c * 4        # sigma / Y / Z / T / eye temps
                + 2 * tb * 128 * 4)          # double-buffered output blocks
    vmem_limit = int(min(max(2 * work_set, 32 << 20), (vmem_cap * 3) // 4))

    kernel = functools.partial(_global_cov_pool_kernel, n_total=n, tb=tb, c=c,
                               precision=matmul_precision)

    out = pl.pallas_call(
        kernel,
        out_shape=jax.ShapeDtypeStruct((b, 1, c), jnp.float32),
        grid_spec=pltpu.PrefetchScalarGridSpec(
            num_scalar_prefetch=0,
            grid=(b // tb, n_pad // tn),        # reduction (spatial) axis last
            in_specs=[pl.BlockSpec((p, tn), lambda i, k: (i, k))],
            out_specs=pl.BlockSpec((tb, 1, c), lambda i, k: (i, 0, 0)),
            scratch_shapes=[pltpu.VMEM((p, p), jnp.float32),
                            pltpu.VMEM((p, 1), jnp.float32)],
        ),
        compiler_params=pltpu.CompilerParams(
            dimension_semantics=("parallel", "arbitrary"),
            vmem_limit_bytes=vmem_limit,
        ),
    )(x2d)

    return out.reshape(b, c, 1, 1)


def init_unused_conv_params(c, d, key):
    """Deterministic init of the module's (declared-but-unused) 1x1 conv weights."""
    k1, k2 = jax.random.split(key)
    bound1 = 1.0 / jnp.sqrt(float(c))     # kaiming_uniform(a=sqrt(5)), fan_in = c
    w1 = jax.random.uniform(k1, (d, c, 1, 1), jnp.float32, -bound1, bound1)
    bound2 = 1.0 / jnp.sqrt(float(d))     # fan_in = d
    w2 = jax.random.uniform(k2, (c, d, 1, 1), jnp.float32, -bound2, bound2)
    return w1, w2


def _reference_forward(x):
    """Pure-JAX transliteration of the PyTorch forward (explicit N x N centering
    matrix; test-only, O(N^2) memory)."""
    hp = lax.Precision.HIGHEST
    b, c, h, w = x.shape
    n = h * w
    X = jnp.transpose(x, (0, 2, 3, 1)).reshape(b, n, c).astype(jnp.float32)
    Xt = jnp.transpose(X, (0, 2, 1))
    M = ((1.0 / n) * jnp.eye(n, dtype=jnp.float32)
         - (1.0 / (n * n)) * jnp.ones((n, n), jnp.float32))
    sigma = jnp.einsum('bcn,nm->bcm', Xt, M, precision=hp)
    sigma = jnp.einsum('bcm,bmd->bcd', sigma, X, precision=hp)
    tr = jnp.trace(sigma, axis1=1, axis2=2).reshape(b, 1, 1)
    sigma = jnp.trunc(1.0 / tr) * sigma                                 # int64 cast
    Y = sigma
    Z = jnp.broadcast_to(jnp.eye(c, dtype=jnp.float32), (b, c, c))
    eye3 = 3.0 * jnp.eye(c, dtype=jnp.float32)
    for _ in range(NS_ITERS):
        T = eye3 - jnp.einsum('bij,bjk->bik', Z, Y, precision=hp)
        Y_new = (0.5 * Y) * T                                           # elementwise
        Z = jnp.einsum('bij,bjk->bik', 0.5 * T, Z, precision=hp)
        Y = Y_new
    trY = jnp.trace(Y, axis1=1, axis2=2).reshape(b, 1, 1)
    Y_hat = jnp.trunc(jnp.sqrt(trY)) * Y                                # int64 cast
    return jnp.mean(Y_hat, axis=1).reshape(b, c, 1, 1)


def _check(y, x, name):
    assert y.shape == (x.shape[0], x.shape[1], 1, 1) and y.dtype == jnp.float32
    assert bool(jnp.all(jnp.isfinite(y))), f"{name}: non-finite kernel output"
    y_ref = _reference_forward(x)
    assert bool(jnp.allclose(y, y_ref, rtol=5e-3, atol=1e-5)), (
        f"{name}: mismatch vs reference, max abs diff = "
        f"{float(jnp.max(jnp.abs(y - y_ref)))}")


if __name__ == "__main__":
    key = jax.random.PRNGKey(0)
    kx1, kx2, kp = jax.random.split(key, 3)

    C, D = 8, 4

    # Unused in forward() (as in the reference module); kept for parameter parity.
    w_conv1, w_conv2 = init_unused_conv_params(C, D, kp)
    assert w_conv1.shape == (D, C, 1, 1) and w_conv2.shape == (C, D, 1, 1)

    # Scale the input down so trace(sigma) < 1; otherwise the reference's int64
    # truncation of 1/trace zeroes the whole result (which we still reproduce).

    # Config A: default auto-tiling (generation-aware TB / TN / VMEM budget,
    # packed Gram with diagonal-block extraction).
    xa = 0.05 * jax.random.normal(kx1, (4, C, 16, 16), jnp.float32)
    ya = global_cov_pooling(xa)
    jax.block_until_ready(ya)
    _check(ya, xa, "config_a")

    # Config B: explicit small tiles -> exercises the streamed spatial
    # accumulation (4 reduction steps), zero padding (20*20=400 -> 512) and the
    # TB=2 packed-Gram path.
    xb = 0.05 * jax.random.normal(kx2, (2, C, 20, 20), jnp.float32)
    yb = global_cov_pooling(xb, tb=2, tn=128)
    jax.block_until_ready(yb)
    _check(yb, xb, "config_b")

    print("KERNEL_OK")
</pallas_src>

<mosaic_0001>
module attributes {stable_mosaic.version = 11 : i64} {
  func.func @_global_cov_pool_kernel(%arg0: i32, %arg1: i32, %arg2: memref<16x256xf32, #tpu.memory_space<vmem>>, %arg3: memref<2x1x8xf32, #tpu.memory_space<vmem>>, %arg4: memref<16x16xf32, #tpu.memory_space<vmem>>, %arg5: memref<16x1xf32, #tpu.memory_space<vmem>>) attributes {dimension_semantics = [#tpu.dimension_semantics<parallel>, #tpu.dimension_semantics<arbitrary>], iteration_bounds = array<i64: 2, 1>, scalar_prefetch = 0 : i64, scratch_operands = 2 : i64, tpu.core_type = #tpu.core_type<tc>, window_params = [{transform_indices = @transform_0, window_bounds = array<i64: 16, 256>}, {transform_indices = @transform_1, window_bounds = array<i64: 2, 1, 8>}]} {
    %c0_i32 = arith.constant 0 : i32
    %0 = arith.cmpi eq, %arg1, %c0_i32 : i32
    %1 = arith.extui %0 : i1 to i32
    %c0_i32_0 = arith.constant 0 : i32
    %2 = arith.cmpi ne, %1, %c0_i32_0 : i32
    scf.if %2 {
      %cst_13 = arith.constant 0.000000e+00 : f32
      %16 = vector.broadcast %cst_13 : f32 to vector<16x16xf32>
      %c0_14 = arith.constant 0 : index
      %c0_15 = arith.constant 0 : index
      %17 = vector.load %arg4[%c0_14, %c0_15] : memref<16x16xf32, #tpu.memory_space<vmem>>, vector<16x16xf32>
      tpu.vector_store %arg4[%c0_14, %c0_15], %16 {strides = array<i32>} : memref<16x16xf32, #tpu.memory_space<vmem>>, vector<16x16xf32>,
      %cst_16 = arith.constant 0.000000e+00 : f32
      %18 = vector.broadcast %cst_16 : f32 to vector<16x1xf32>
      %c0_17 = arith.constant 0 : index
      %c0_18 = arith.constant 0 : index
      %19 = vector.load %arg5[%c0_17, %c0_18] : memref<16x1xf32, #tpu.memory_space<vmem>>, vector<16x1xf32>
      tpu.vector_store %arg5[%c0_17, %c0_18], %18 {strides = array<i32>} : memref<16x1xf32, #tpu.memory_space<vmem>>, vector<16x1xf32>,
    } else {
    }
    %c0 = arith.constant 0 : index
    %c0_1 = arith.constant 0 : index
    %3 = vector.load %arg2[%c0, %c0_1] : memref<16x256xf32, #tpu.memory_space<vmem>>, vector<16x256xf32>
    %c0_2 = arith.constant 0 : index
    %c0_3 = arith.constant 0 : index
    %4 = vector.load %arg4[%c0_2, %c0_3] : memref<16x16xf32, #tpu.memory_space<vmem>>, vector<16x16xf32>
    %cst = arith.constant dense<0.000000e+00> : vector<16x16xf32>
    %5 = tpu.matmul %3, %3, %cst {dimension_numbers = #tpu.dot_dimension_numbers<[1], [1], [0], [0], [0, 0, 1, 0], [], []>, precision = #tpu.contract_precision<fp32>} : vector<16x256xf32>, vector<16x256xf32>, vector<16x16xf32> -> vector<16x16xf32>
    %6 = arith.addf %4, %5 : vector<16x16xf32>
    %c0_4 = arith.constant 0 : index
    %c0_5 = arith.constant 0 : index
    %7 = vector.load %arg4[%c0_4, %c0_5] : memref<16x16xf32, #tpu.memory_space<vmem>>, vector<16x16xf32>
    tpu.vector_store %arg4[%c0_4, %c0_5], %6 {strides = array<i32>} : memref<16x16xf32, #tpu.memory_space<vmem>>, vector<16x16xf32>,
    %c0_6 = arith.constant 0 : index
    %c0_7 = arith.constant 0 : index
    %8 = vector.load %arg5[%c0_6, %c0_7] : memref<16x1xf32, #tpu.memory_space<vmem>>, vector<16x1xf32>
    %cst_8 = arith.constant dense<0.000000e+00> : vector<16xf32>
    %9 = vector.multi_reduction <add>, %3, %cst_8 [1] : vector<16x256xf32> to vector<16xf32>
    %10 = vector.shape_cast %9 : vector<16xf32> to vector<16x1xf32>
    %11 = arith.addf %8, %10 : vector<16x1xf32>
    %c0_9 = arith.constant 0 : index
    %c0_10 = arith.constant 0 : index
    %12 = vector.load %arg5[%c0_9, %c0_10] : memref<16x1xf32, #tpu.memory_space<vmem>>, vector<16x1xf32>
    tpu.vector_store %arg5[%c0_9, %c0_10], %11 {strides = array<i32>} : memref<16x1xf32, #tpu.memory_space<vmem>>, vector<16x1xf32>,
    %c0_i32_11 = arith.constant 0 : i32
    %13 = arith.cmpi eq, %arg1, %c0_i32_11 : i32
    %14 = arith.extui %13 : i1 to i32
    %c0_i32_12 = arith.constant 0 : i32
    %15 = arith.cmpi ne, %14, %c0_i32_12 : i32
    scf.if %15 {
      %c0_13 = arith.constant 0 : index
      %c0_14 = arith.constant 0 : index
      %16 = vector.load %arg4[%c0_13, %c0_14] : memref<16x16xf32, #tpu.memory_space<vmem>>, vector<8x8xf32>
      %c0_15 = arith.constant 0 : index
      %c0_16 = arith.constant 0 : index
      %17 = vector.load %arg5[%c0_15, %c0_16] : memref<16x1xf32, #tpu.memory_space<vmem>>, vector<8x1xf32>
      %c8 = arith.constant 8 : index
      %c8_17 = arith.constant 8 : index
      %18 = vector.load %arg4[%c8, %c8_17] : memref<16x16xf32, #tpu.memory_space<vmem>>, vector<8x8xf32>
      %c8_18 = arith.constant 8 : index
      %c0_19 = arith.constant 0 : index
      %19 = vector.load %arg5[%c8_18, %c0_19] : memref<16x1xf32, #tpu.memory_space<vmem>>, vector<8x1xf32>
      %20 = vector.shape_cast %16 : vector<8x8xf32> to vector<1x8x8xf32>
      %21 = vector.shape_cast %18 : vector<8x8xf32> to vector<1x8x8xf32>
      %22 = tpu.concatenate %20, %21 in 0 : vector<1x8x8xf32>, vector<1x8x8xf32> -> vector<2x8x8xf32>
      %23 = vector.shape_cast %17 : vector<8x1xf32> to vector<1x8x1xf32>
      %24 = vector.shape_cast %19 : vector<8x1xf32> to vector<1x8x1xf32>
      %25 = tpu.concatenate %23, %24 in 0 : vector<1x8x1xf32>, vector<1x8x1xf32> -> vector<2x8x1xf32>
      %cst_20 = arith.constant dense<0.000000e+00> : vector<2x8x8xf32>
      %26 = tpu.matmul %25, %25, %cst_20 {dimension_numbers = #tpu.dot_dimension_numbers<[2], [2], [1], [1], [0, 0, 0, 1, 1, 1], [0], [0]>, precision = #tpu.contract_precision<fp32>} : vector<2x8x1xf32>, vector<2x8x1xf32>, vector<2x8x8xf32> -> vector<2x8x8xf32>
      %cst_21 = arith.constant 3.906250e-03 : f32
      %27 = vector.broadcast %cst_21 : f32 to vector<2x8x8xf32>
      %28 = arith.mulf %27, %26 : vector<2x8x8xf32>
      %29 = arith.subf %22, %28 : vector<2x8x8xf32>
      %cst_22 = arith.constant 3.906250e-03 : f32
      %30 = vector.broadcast %cst_22 : f32 to vector<2x8x8xf32>
      %31 = arith.mulf %30, %29 : vector<2x8x8xf32>
      %32 = tpu.iota {dimensions = array<i32: 0>} : vector<8x8xi32>
      %33 = tpu.iota {dimensions = array<i32: 1>} : vector<8x8xi32>
      %34 = arith.cmpi eq, %32, %33 : vector<8x8xi32>
      %35 = arith.extui %34 : vector<8x8xi1> to vector<8x8xi32>
      %36 = arith.sitofp %35 : vector<8x8xi32> to vector<8x8xf32>
      %37 = vector.shape_cast %36 : vector<8x8xf32> to vector<1x8x8xf32>
      %cst_23 = arith.constant 3.000000e+00 : f32
      %38 = vector.broadcast %cst_23 : f32 to vector<8x8xf32>
      %39 = arith.mulf %38, %36 : vector<8x8xf32>
      %40 = vector.shape_cast %39 : vector<8x8xf32> to vector<1x8x8xf32>
      %41 = vector.broadcast %40 : vector<1x8x8xf32> to vector<2x8x8xf32>
      %42 = vector.broadcast %37 : vector<1x8x8xf32> to vector<2x8x8xf32>
      %43 = arith.mulf %31, %42 : vector<2x8x8xf32>
      %cst_24 = arith.constant dense<0.000000e+00> : vector<2x8xf32>
      %44 = vector.multi_reduction <add>, %43, %cst_24 [2] : vector<2x8x8xf32> to vector<2x8xf32>
      %45 = vector.shape_cast %44 : vector<2x8xf32> to vector<2x8x1xf32>
      %cst_25 = arith.constant dense<0.000000e+00> : vector<2x1xf32>
      %46 = vector.multi_reduction <add>, %45, %cst_25 [1] : vector<2x8x1xf32> to vector<2x1xf32>
      %47 = vector.shape_cast %46 : vector<2x1xf32> to vector<2x1x1xf32>
      %cst_26 = arith.constant 1.000000e+00 : f32
      %48 = vector.broadcast %cst_26 : f32 to vector<2x1x1xf32>
      %49 = arith.divf %48, %47 : vector<2x1x1xf32>
      %cst_27 = arith.constant 0.000000e+00 : f32
      %50 = vector.broadcast %cst_27 : f32 to vector<2x1x1xf32>
      %51 = arith.cmpf olt, %49, %50 : vector<2x1x1xf32>
      %52 = math.ceil %49 : vector<2x1x1xf32>
      %53 = math.floor %49 : vector<2x1x1xf32>
      %54 = arith.select %51, %52, %53 : vector<2x1x1xi1>, vector<2x1x1xf32>
      %55 = vector.broadcast %54 : vector<2x1x1xf32> to vector<2x8x8xf32>
      %56 = arith.mulf %55, %31 : vector<2x8x8xf32>
      %57 = vector.shape_cast %36 : vector<8x8xf32> to vector<1x8x8xf32>
      %58 = vector.broadcast %57 : vector<1x8x8xf32> to vector<2x8x8xf32>
      %cst_28 = arith.constant dense<0.000000e+00> : vector<2x8x8xf32>
      %59 = tpu.matmul %58, %56, %cst_28 {dimension_numbers = #tpu.dot_dimension_numbers<[2], [1], [1], [2], [0, 0, 0, 1, 1, 2], [0], [0]>, precision = #tpu.contract_precision<fp32>} : vector<2x8x8xf32>, vector<2x8x8xf32>, vector<2x8x8xf32> -> vector<2x8x8xf32>
      %60 = arith.subf %41, %59 : vector<2x8x8xf32>
      %cst_29 = arith.constant 5.000000e-01 : f32
      %61 = vector.broadcast %cst_29 : f32 to vector<2x8x8xf32>
      %62 = arith.mulf %61, %56 : vector<2x8x8xf32>
      %63 = arith.mulf %62, %60 : vector<2x8x8xf32>
      %cst_30 = arith.constant 5.000000e-01 : f32
      %64 = vector.broadcast %cst_30 : f32 to vector<2x8x8xf32>
      %65 = arith.mulf %64, %60 : vector<2x8x8xf32>
      %cst_31 = arith.constant dense<0.000000e+00> : vector<2x8x8xf32>
      %66 = tpu.matmul %65, %58, %cst_31 {dimension_numbers = #tpu.dot_dimension_numbers<[2], [1], [1], [2], [0, 0, 0, 1, 1, 2], [0], [0]>, precision = #tpu.contract_precision<fp32>} : vector<2x8x8xf32>, vector<2x8x8xf32>, vector<2x8x8xf32> -> vector<2x8x8xf32>
      %cst_32 = arith.constant dense<0.000000e+00> : vector<2x8x8xf32>
      %67 = tpu.matmul %66, %63, %cst_32 {dimension_numbers = #tpu.dot_dimension_numbers<[2], [1], [1], [2], [0, 0, 0, 1, 1, 2], [0], [0]>, precision = #tpu.contract_precision<fp32>} : vector<2x8x8xf32>, vector<2x8x8xf32>, vector<2x8x8xf32> -> vector<2x8x8xf32>
      %68 = arith.subf %41, %67 : vector<2x8x8xf32>
      %cst_33 = arith.constant 5.000000e-01 : f32
      %69 = vector.broadcast %cst_33 : f32 to vector<2x8x8xf32>
      %70 = arith.mulf %69, %63 : vector<2x8x8xf32>
      %71 = arith.mulf %70, %68 : vector<2x8x8xf32>
      %cst_34 = arith.constant 5.000000e-01 : f32
      %72 = vector.broadcast %cst_34 : f32 to vector<2x8x8xf32>
      %73 = arith.mulf %72, %68 : vector<2x8x8xf32>
      %cst_35 = arith.constant dense<0.000000e+00> : vector<2x8x8xf32>
      %74 = tpu.matmul %73, %66, %cst_35 {dimension_numbers = #tpu.dot_dimension_numbers<[2], [1], [1], [2], [0, 0, 0, 1, 1, 2], [0], [0]>, precision = #tpu.contract_precision<fp32>} : vector<2x8x8xf32>, vector<2x8x8xf32>, vector<2x8x8xf32> -> vector<2x8x8xf32>
      %cst_36 = arith.constant dense<0.000000e+00> : vector<2x8x8xf32>
      %75 = tpu.matmul %74, %71, %cst_36 {dimension_numbers = #tpu.dot_dimension_numbers<[2], [1], [1], [2], [0, 0, 0, 1, 1, 2], [0], [0]>, precision = #tpu.contract_precision<fp32>} : vector<2x8x8xf32>, vector<2x8x8xf32>, vector<2x8x8xf32> -> vector<2x8x8xf32>
      %76 = arith.subf %41, %75 : vector<2x8x8xf32>
      %cst_37 = arith.constant 5.000000e-01 : f32
      %77 = vector.broadcast %cst_37 : f32 to vector<2x8x8xf32>
      %78 = arith.mulf %77, %71 : vector<2x8x8xf32>
      %79 = arith.mulf %78, %76 : vector<2x8x8xf32>
      %cst_38 = arith.constant 5.000000e-01 : f32
      %80 = vector.broadcast %cst_38 : f32 to vector<2x8x8xf32>
      %81 = arith.mulf %80, %76 : vector<2x8x8xf32>
      %cst_39 = arith.constant dense<0.000000e+00> : vector<2x8x8xf32>
      %82 = tpu.matmul %81, %74, %cst_39 {dimension_numbers = #tpu.dot_dimension_numbers<[2], [1], [1], [2], [0, 0, 0, 1, 1, 2], [0], [0]>, precision = #tpu.contract_precision<fp32>} : vector<2x8x8xf32>, vector<2x8x8xf32>, vector<2x8x8xf32> -> vector<2x8x8xf32>
      %cst_40 = arith.constant dense<0.000000e+00> : vector<2x8x8xf32>
      %83 = tpu.matmul %82, %79, %cst_40 {dimension_numbers = #tpu.dot_dimension_numbers<[2], [1], [1], [2], [0, 0, 0, 1, 1, 2], [0], [0]>, precision = #tpu.contract_precision<fp32>} : vector<2x8x8xf32>, vector<2x8x8xf32>, vector<2x8x8xf32> -> vector<2x8x8xf32>
      %84 = arith.subf %41, %83 : vector<2x8x8xf32>
      %cst_41 = arith.constant 5.000000e-01 : f32
      %85 = vector.broadcast %cst_41 : f32 to vector<2x8x8xf32>
      %86 = arith.mulf %85, %79 : vector<2x8x8xf32>
      %87 = arith.mulf %86, %84 : vector<2x8x8xf32>
      %cst_42 = arith.constant 5.000000e-01 : f32
      %88 = vector.broadcast %cst_42 : f32 to vector<2x8x8xf32>
      %89 = arith.mulf %88, %84 : vector<2x8x8xf32>
      %cst_43 = arith.constant dense<0.000000e+00> : vector<2x8x8xf32>
      %90 = tpu.matmul %89, %82, %cst_43 {dimension_numbers = #tpu.dot_dimension_numbers<[2], [1], [1], [2], [0, 0, 0, 1, 1, 2], [0], [0]>, precision = #tpu.contract_precision<fp32>} : vector<2x8x8xf32>, vector<2x8x8xf32>, vector<2x8x8xf32> -> vector<2x8x8xf32>
      %cst_44 = arith.constant dense<0.000000e+00> : vector<2x8x8xf32>
      %91 = tpu.matmul %90, %87, %cst_44 {dimension_numbers = #tpu.dot_dimension_numbers<[2], [1], [1], [2], [0, 0, 0, 1, 1, 2], [0], [0]>, precision = #tpu.contract_precision<fp32>} : vector<2x8x8xf32>, vector<2x8x8xf32>, vector<2x8x8xf32> -> vector<2x8x8xf32>
      %92 = arith.subf %41, %91 : vector<2x8x8xf32>
      %cst_45 = arith.constant 5.000000e-01 : f32
      %93 = vector.broadcast %cst_45 : f32 to vector<2x8x8xf32>
      %94 = arith.mulf %93, %87 : vector<2x8x8xf32>
      %95 = arith.mulf %94, %92 : vector<2x8x8xf32>
      %cst_46 = arith.constant 5.000000e-01 : f32
      %96 = vector.broadcast %cst_46 : f32 to vector<2x8x8xf32>
      %97 = arith.mulf %96, %92 : vector<2x8x8xf32>
      %cst_47 = arith.constant dense<0.000000e+00> : vector<2x8x8xf32>
      %98 = tpu.matmul %97, %90, %cst_47 {dimension_numbers = #tpu.dot_dimension_numbers<[2], [1], [1], [2], [0, 0, 0, 1, 1, 2], [0], [0]>, precision = #tpu.contract_precision<fp32>} : vector<2x8x8xf32>, vector<2x8x8xf32>, vector<2x8x8xf32> -> vector<2x8x8xf32>
      %cst_48 = arith.constant dense<0.000000e+00> : vector<2x8x8xf32>
      %99 = tpu.matmul %98, %95, %cst_48 {dimension_numbers = #tpu.dot_dimension_numbers<[2], [1], [1], [2], [0, 0, 0, 1, 1, 2], [0], [0]>, precision = #tpu.contract_precision<fp32>} : vector<2x8x8xf32>, vector<2x8x8xf32>, vector<2x8x8xf32> -> vector<2x8x8xf32>
      %100 = arith.subf %41, %99 : vector<2x8x8xf32>
      %cst_49 = arith.constant 5.000000e-01 : f32
      %101 = vector.broadcast %cst_49 : f32 to vector<2x8x8xf32>
      %102 = arith.mulf %101, %95 : vector<2x8x8xf32>
      %103 = arith.mulf %102, %100 : vector<2x8x8xf32>
      %104 = vector.broadcast %37 : vector<1x8x8xf32> to vector<2x8x8xf32>
      %105 = arith.mulf %103, %104 : vector<2x8x8xf32>
      %cst_50 = arith.constant dense<0.000000e+00> : vector<2x8xf32>
      %106 = vector.multi_reduction <add>, %105, %cst_50 [2] : vector<2x8x8xf32> to vector<2x8xf32>
      %107 = vector.shape_cast %106 : vector<2x8xf32> to vector<2x8x1xf32>
      %cst_51 = arith.constant dense<0.000000e+00> : vector<2x1xf32>
      %108 = vector.multi_reduction <add>, %107, %cst_51 [1] : vector<2x8x1xf32> to vector<2x1xf32>
      %109 = vector.shape_cast %108 : vector<2x1xf32> to vector<2x1x1xf32>
      %110 = math.sqrt %109 : vector<2x1x1xf32>
      %cst_52 = arith.constant 0.000000e+00 : f32
      %111 = vector.broadcast %cst_52 : f32 to vector<2x1x1xf32>
      %112 = arith.cmpf olt, %110, %111 : vector<2x1x1xf32>
      %113 = math.ceil %110 : vector<2x1x1xf32>
      %114 = math.floor %110 : vector<2x1x1xf32>
      %115 = arith.select %112, %113, %114 : vector<2x1x1xi1>, vector<2x1x1xf32>
      %116 = vector.broadcast %115 : vector<2x1x1xf32> to vector<2x8x8xf32>
      %117 = arith.mulf %116, %103 : vector<2x8x8xf32>
      %cst_53 = arith.constant dense<0.000000e+00> : vector<2x8xf32>
      %118 = vector.multi_reduction <add>, %117, %cst_53 [1] : vector<2x8x8xf32> to vector<2x8xf32>
      %119 = vector.shape_cast %118 : vector<2x8xf32> to vector<2x1x8xf32>
      %cst_54 = arith.constant 8.000000e+00 : f32
      %120 = vector.broadcast %cst_54 : f32 to vector<2x1x8xf32>
      %121 = arith.divf %119, %120 : vector<2x1x8xf32>
      %c0_55 = arith.constant 0 : index
      %c0_56 = arith.constant 0 : index
      %c0_57 = arith.constant 0 : index
      %122 = vector.load %arg3[%c0_55, %c0_56, %c0_57] : memref<2x1x8xf32, #tpu.memory_space<vmem>>, vector<2x1x8xf32>
      tpu.vector_store %arg3[%c0_55, %c0_56, %c0_57], %121 {strides = array<i32>} : memref<2x1x8xf32, #tpu.memory_space<vmem>>, vector<2x1x8xf32>,
    } else {
    }
    return
  }
  func.func @transform_0(%arg0: i32, %arg1: i32) -> (i32, i32) {
    %c0_i32 = arith.constant 0 : i32
    return %arg0, %arg1 : i32, i32
  }
  func.func @transform_1(%arg0: i32, %arg1: i32) -> (i32, i32, i32) {
    %c0_i32 = arith.constant 0 : i32
    %c0_i32_0 = arith.constant 0 : i32
    %c0_i32_1 = arith.constant 0 : i32
    return %arg0, %c0_i32, %c0_i32_0 : i32, i32, i32
  }
}

</mosaic_0001>

<bundles_post_ra>
// kernel: tpu_custom_call.1
= control target key start
LH: loop header
LB: loop body
LE: loop exit
PB: predicated region body
PF: predicated region fallthrough
CT: control target
= control target key end

     0   :  { %6 = vsyncpa [#allocation5], 0  ;;  %s14246_s0 = inlined_call_operand.hbm [shape: f32[32,256], index: 0, kind: input, shape index: {}]   ;;  %s14247_s1 = inlined_call_operand.hbm [shape: f32[4,1,8], index: 1, kind: output, shape index: {}]  }
   0x1   :  { %8 = vsyncpa [#allocation5 + $0x1], 0 }
   0x2   :  { %9 = vsyncpa [#allocation6], 0 }
   0x3   :  { %11 = vsyncpa [#allocation6 + $0x1], 0  ;;  %s13300_s6 = smov 0   ;;  %s13302_s7 = smov 0  }
   0x4   :  { %s13304_s8 = smov 0   ;;  %s13306_s9 = smov 0  }
   0x5   :  { %s13308_s10 = smov 0   ;;  %s13310_s11 = smov 0  }
   0x6 LB: > { %s11784_s12 = sadd.s32 4294967295, %s13278_s11   ;;  %s11785_s13 = sadd.s32 4294967294, %s13278_s11   ;;  %s13278_s11 = sphi %s13310_s11, %s17_s11   ;;  %s13274_s10 = sphi %s13308_s10, %s14264_s10   ;;  %s13270_s9 = sphi %s13306_s9, %s14263_s9   ;;  %s13266_s8 = sphi %s13304_s8, %s14262_s8   ;;  %s13262_s7 = sphi %s13302_s7, %s14261_s7   ;;  %s13258_s6 = sphi %s13300_s6, %s14260_s6  }
   0x7   : > { %s29_s14 = sadd.s32 1, %s13274_s10  ;;  %s38_s15 = sadd.s32 1, %s13266_s8 }
   0x8   : > { %p31_p0 = scmp.ge.s32.totalorder %s29_s14, 2  ;;  %p45_p1 = scmp.ne.s32.totalorder %s13266_s8, %s13262_s7 }
   0x9   : > { %p46_p2 = scmp.eq.s32.totalorder %s13278_s11, 0  ;;  %p51_p3 = scmp.ne.s32.totalorder %s13262_s7, %s13258_s6 }
   0xa   : > { %s14266_s14 = smov (%p31_p0, %s29_s14), 0  ;;  %p52_p5 = scmp.eq.s32.totalorder %s11784_s12, 0 }
   0xb   : > { %p13341_p4 = por %p46_p2, %p45_p1  ;;  %s33_s17 = ssub.s32 %s13274_s10, %s14266_s14 }
   0xc   : > { %p75_p6 = scmp.eq.s32.totalorder %s11784_s12, 1  ;;  %p36_p7 = scmp.eq.s32.totalorder %s33_s17, 0 }
   0xd   : > { %p13347_p8 = por %p52_p5, %p51_p3  ;;  %p81_p10 = scmp.eq.s32.totalorder %s11785_s13, 1 }
   0xe   : > { %p13351_p9 = por %p75_p6, %p45_p1  ;;  %p13100_p13 = scmp.lt.s32.totalorder %s13278_s11, 2 }
   0xf   : > { %s13356_s20 = scalar_select %p36_p7, %s13266_s8, %s38_s15  }
  0x10   : > { %s14251_s19 = scalar_select %p13351_p9, 1, 0 }
  0x11   : > { %p13358_p11 = por %p81_p10, %p51_p3  ;;  %s101_s22 = sand.u32 1, %s13266_s8  }
  0x12   : > { %s11788_s23 = sshll.u32 %s101_s22, 5  ;;  %s11814_s24 = sshll.u32 %s13274_s10, 9 }
  0x13   : > { %s14252_s21 = scalar_select %p13358_p11, 1, 0 }
  0x14   : > { %s13369_s27 = scalar_lea.hbm %s14246_s0, %s11814_s24  ;;  %s105_s28 = scalar_lea.vmem [#allocation4], %s11788_s23 }
  0x15   : > { %s115_s29 = sshll.u32 %s105_s28, 4  ;;  %p13375_p0 = pnand %p13100_p13, %p13341_p4  ;;  %s13371_s29 = int_to_ptr.vmem [resolvable:$true] %s115_s29 }
  0x16   : > { %s13380_s2 = scalar_lea.sflag [#allocation5], %s101_s22  ;;  %s13166_s3 = scalar_lea.hbm %s13369_s27, 512 }
  0x17   : > { %p13167_p2 = scmp.ne.s32.totalorder %s13369_s27, %s13166_s3  ;;  %p13168_p3 = pneg %p13375_p0 }
  0x18   : > { %s13171_s12 = scalar_lea.hbm %s14246_s0, 1024  ;;  %p13172_p4 = scmp.lt.u32.totalorder %s13369_s27, %s14246_s0 }
  0x19   : > { %p13169_p5 = pnand %p13168_p3, %p13167_p2  ;;  %p13173_p7 = scmp.lt.u32.totalorder %s13171_s12, %s13166_s3 }
  0x1a   : > { %p13175_p13 = scmp.lt.u32.totalorder %s13166_s3, %s13369_s27 }
  0x1b   : > { %p13170_p6 = pneg %p13169_p5  ;;  %p13174_p10 = por %p13173_p7, %p13172_p4 }
  0x1d   : > { %p13176_p12 = por %p13175_p13, %p13174_p10 }
  0x1f   : > { %p13177_p1 = pnand %p13176_p12, %p13170_p6 }
  0x21   : > { %13180 = shalt.err (!%p13177_p1)
}
  0x22   : > { %s13181_s16 = scalar_lea.vmem %s13371_s29, 512  ;;  %s13280_s17 = smov [#allocation4]  }
  0x23   : > { %p13182_p2 = scmp.ne.s32.totalorder %s13371_s29, %s13181_s16  ;;  %s13186_s22 = sshll.u32 %s13280_s17, 4  ;;  %s13187_s22 = int_to_ptr.vmem [resolvable:$false] %s13186_s22 }
  0x24   : > { %s13188_s23 = scalar_lea.vmem %s13187_s22, 1024  ;;  %p13189_p9 = scmp.lt.s32.totalorder %s13371_s29, %s13187_s22 }
  0x25   : > { %p13184_p5 = pnand %p13182_p2, %p13168_p3  ;;  %p13190_p4 = scmp.lt.s32.totalorder %s13188_s23, %s13181_s16 }
  0x27   : > { %p13185_p11 = pneg %p13184_p5  ;;  %p13191_p7 = por %p13190_p4, %p13189_p9 }
  0x29   : > { %p13192_p10 = pnand %p13191_p7, %p13185_p11 }
  0x2b   : > { %13195 = shalt.err (!%p13192_p10)
}
  0x2c   : > { %s13281_s24 = smov 256   ;;  %s13282_s25 = smov 16  }
  0x2d   : > { %13095 = dma.hbm_to_vmem [thread:$0]  (!%p13375_p0), %s13369_s27, 512, %s13371_s29, %s13380_s2, %s13281_s24, %s13281_s24, %s13282_s25  }
  0x2e   : > { %p123_p12 = scmp.lt.s32.totalorder %s13278_s11, 3  ;;  %p14254_p1 = scmp.ge.s32.totalorder %s13278_s11, 1 }
  0x30   : > { %p124_p3 = pnand %p14254_p1, %p123_p12 }
  0x31   : > { %s13412_s26 = sand.u32 (!%p124_p3), 1, %s13262_s7  }
  0x32   : > { %127 = sbr.rel (%p124_p3) target bundleno = 3775 (0xebf), region = 24  ;;  %s11793_s28 = sshll.u32 (!%p124_p3), %s13412_s26, 5 }
  0x33   : > { %s130_s3 = scalar_lea.sflag (!%p124_p3), [#allocation5], %s13412_s26  ;;  %s133_s4 = scalar_lea.vmem (!%p124_p3), [#allocation4], %s11793_s28 }
  0x39   : > { %13249 = dma.done.wait (%p13347_p8), %s130_s3, 512  }
  0x3a   : > { %13251 = vsyncadd (%p13347_p8), %s130_s3, 4294966784  ;;  %vm162_vm0 = vcmask 7168   ;;  %v13283_v0 = vmov 0.0   ;;  %v165_v1 = vld [vmem:[%s133_s4] sm:$0xff]  ;;  %v166_v2 = vld [vmem:[%s133_s4 + $0x8] sm:$0xff]  ;;  %vm13284_vm1 = vmmov 0  }
  0x3b   : > { %163 = vst.msk [vmem:[#allocation3] sm:$0xff] %vm162_vm0, %v13283_v0  ;;  %164 = vst.msk [vmem:[#allocation3 + $0x8] sm:$0xff] %vm162_vm0, %v13283_v0  ;;  %v167_v3 = vld [vmem:[%s133_s4 + $0x10] sm:$0xff]  ;;  %v13424_v4 = vand.u32 4294901760, %v166_v2  ;;  %v732_v5 = vadd.f32 %v166_v2, %v165_v1  ;;  %v13426_v6 = vand.u32 4294901760, %v165_v1  ;;  %v168_v7 = vld [vmem:[%s133_s4 + $0x18] sm:$0xff] }
  0x3c   : > { %v13428_v8 = vand.u32 4294901760, %v167_v3  ;;  %v13430_v9 = vand.u32 4294901760, %v168_v7  ;;  %v735_v10 = vadd.f32 %v168_v7, %v167_v3  ;;  %vm159_vm2 = vcmask 130048   ;;  %s13285_s18 = smov 120   ;;  %s11794_s27 = sshll.u32 %s13412_s26, 1 }
  0x3d   : > { %v240_v11 = vsub.f32 %v166_v2, %v13424_v4  ;;  %733 = vadd.xlane.f32.xlu0 %v732_v5  ;;  %v246_v12 = vsub.f32 %v165_v1, %v13426_v6  ;;  %355 = vmatprep.mubr.f32.mxu1 %v13424_v4  ;;  %160 = vst.msk [vmem:[#allocation2] sm:$0xff] %vm159_vm2, %v13283_v0  ;;  %161 = vst.msk [vmem:[#allocation2 + $0x8] sm:$0xff] %vm159_vm2, %v13283_v0  ;;  %vm1668_vm4 = vcmask 64512   ;;  %vm11683_vm13 = vcmask 57344   ;;  %s11815_s29 = sshll.u32 %s13270_s9, 5  ;;  %s151_s30 = scalar_lea.vmem [#allocation7], %s11794_s27 }
  0x3e   : > { %v261_v13 = vsub.f32 %v167_v3, %v13428_v8  ;;  %v12826_v14 = vpack.c.bf16 %v13428_v8, %v13426_v6  ;;  %v255_v15 = vsub.f32 %v168_v7, %v13430_v9  ;;  %v12824_v16 = vpack.c.bf16 %v13430_v9, %v13424_v4  ;;  %s11700_s2 = sshll.u32 %s151_s30, 4  ;;  %s14195_s13 = scalar_lea.hbm %s14247_s1, %s11815_s29  ;;  %s14197_s2 = int_to_ptr.vmem [resolvable:$true] %s11700_s2 }
  0x3f   : > { %v241_v17 = vand.u32 4294901760, %v240_v11  ;;  %v247_v18 = vand.u32 4294901760, %v246_v12  ;;  %s11687_s15 = scalar_lea.sflag [#allocation6], %s13412_s26  ;;  %s13196_s16 = scalar_lea.vmem %s14197_s2, 32 }
  0x40   : > { %v262_v19 = vand.u32 4294901760, %v261_v13  ;;  %12825 = vmatprep.subr.bf16.mxu0 %v12824_v16  ;;  %v256_v20 = vand.u32 4294901760, %v255_v15  ;;  %v12832_v21 = vpack.c.bf16 %v255_v15, %v240_v11  ;;  %v12834_v31 = vpack.c.bf16 %v261_v13, %v246_v12  ;;  %p13197_p8 = scmp.ne.s32.totalorder %s14197_s2, %s13196_s16  ;;  %p14257_p9 = scmp.ne.s32.totalorder %s14251_s19, 0 }
  0x41   : > { %736 = vadd.xlane.f32.xlu0 %v735_v10  ;;  %12827 = vmatpush1.bf16.xpose.msra.mxu0 %v12826_v14  ;;  %v242_v22 = vsub.f32 %v240_v11, %v241_v17  ;;  %v248_v23 = vsub.f32 %v246_v12, %v247_v18  ;;  %s13287_s9 = smov [#allocation7]  }
  0x42   : > { %v263_v24 = vsub.f32 %v261_v13, %v262_v19  ;;  %v257_v25 = vsub.f32 %v255_v15, %v256_v20  ;;  %12833 = vmatprep.subr.bf16.mxu0 %v12832_v21  ;;  %v12840_v33 = vpack.c.bf16 %v256_v20, %v241_v17  ;;  %v12842_v34 = vpack.c.bf16 %v262_v19, %v247_v18  ;;  %v730_v35 = vld [vmem:[#allocation3] sm:$0xff]  ;;  %v731_v38 = vld [vmem:[#allocation3 + $0x8] sm:$0xff]  ;;  %p13198_p11 = pnand %p13197_p8, %p14257_p9  ;;  %s13200_s17 = sshll.u32 %s13287_s9, 4  ;;  %s13201_s17 = int_to_ptr.vmem [resolvable:$false] %s13200_s17 }
  0x43   : > { %v243_v26 = vand.u32 4294901760, %v242_v22  ;;  %v249_v27 = vand.u32 4294901760, %v248_v23  ;;  %s13202_s22 = scalar_lea.vmem %s13201_s17, 64  ;;  %p13203_p6 = scmp.lt.s32.totalorder %s14197_s2, %s13201_s17 }
  0x44   : > { %v264_v28 = vand.u32 4294901760, %v263_v24  ;;  %v258_v29 = vand.u32 4294901760, %v257_v25  ;;  %v170_v25 = vld [vmem:[#allocation2 + $0x8] sm:$0xff]  ;;  %p13199_p0 = pneg %p13198_p11  ;;  %p13204_p13 = scmp.lt.s32.totalorder %s13202_s22, %s13196_s16 }
  0x45   : > { %244 = vmatprep.mubr.f32.mxu0 %v243_v26 }
  0x46   : > { %v12830_v30 = vpack.c.bf16 %v264_v28, %v249_v27  ;;  %v12828_v32 = vpack.c.bf16 %v258_v29, %v243_v26  ;;  %p13205_p2 = por %p13204_p13, %p13203_p6 }
  0x48   : > { %12829 = vmatprep.subr.bf16.mxu1 %v12828_v32  ;;  %250 = vmatmul.mubr.f32.vlgmr.msra.gmra.mrb[0].mxu0 %v249_v27  ;;  %p13206_p5 = pnand %p13205_p2, %p13199_p0 }
  0x49   : > { %12831 = vmatpush1.bf16.xpose.msra.mxu1 %v12830_v30  ;;  %12835 = vmatpush1.bf16.xpose.msra.mxu0 %v12834_v31  ;;  %v1658_v31 = vlaneseq }
  0x4a   : > { %12837 = vmatprep.subr.bf16.mxu1 %v12824_v16  ;;  %259 = vmatprep.mubr.f32.mxu0 %v258_v29 }
  0x4b   : > { %12841 = vmatprep.subr.bf16.mxu0 %v12840_v33  ;;  %v1659_v32 = vshrl.u32 %v1658_v31, 7  ;;  %v1661_v33 = vand.u32 127, %v1658_v31 }
  0x4c   : > { %265 = vmatmul.mubr.f32.gmra.mrb[2].mxu0 %v264_v28 }
  0x4d   : > { %443 = vmatprep.mubr.f32.mxu0 %v240_v11  ;;  %vm13504_vm3 = vcmp.eq.s32.totalorder %v1659_v32, %v1661_v33 }
  0x50   : > { %357 = vmatmul.mubr.f32.vlgmr.msra.gmra.mrb[0].mxu1 %v13426_v6  ;;  %446 = vmatmul.mubr.f32.vlgmr.msra.gmra.mrb[4].mxu0 %v246_v12 }
  0x51   : > { %12839 = vmatpush1.bf16.xpose.msra.mxu1 %v12826_v14  ;;  %362 = vmatprep.mubr.f32.mxu1 %v13430_v9 }
  0x52   : > { %12843 = vmatpush1.bf16.xpose.msra.mxu0 %v12842_v34  ;;  %12845 = vmatprep.subr.bf16.mxu1 %v12824_v16 }
  0x53   : > { %452 = vmatprep.mubr.f32.mxu0 %v255_v15  ;;  %12104 = vmatprep.subr.mxu0 %v13283_v0 }
  0x54   : > { %364 = vmatmul.mubr.f32.gmra.mrb[2].mxu1 %v13428_v8  ;;  %455 = vmatmul.mubr.f32.gmra.mrb[6].mxu0 %v261_v13 }
  0x55   : > { %531 = vmatprep.mubr.f32.mxu1 %v241_v17  ;;  %628 = vmatprep.mubr.f32.mxu0 %v13424_v4 }
  0x58   : > { %535 = vmatmul.mubr.f32.vlgmr.msra.gmra.mrb[4].mxu1 %v247_v18 }
  0x59   : > { %12847 = vmatpush1.bf16.xpose.msra.mxu1 %v12826_v14  ;;  %542 = vmatprep.mubr.f32.mxu1 %v256_v20  ;;  %v169_v20 = vld [vmem:[#allocation2] sm:$0xff] }
  0x5a   : > { %630 = vmatmul.mubr.f32.vlgmr.msra.gmra.mrb[8].mxu0 %v13426_v6  ;;  %12134 = vmatprep.subr.mxu1 %v13283_v0 }
  0x5b   : > { %635 = vmatprep.mubr.f32.mxu0 %v13430_v9 }
  0x5c   : > { %546 = vmatmul.mubr.f32.gmra.mrb[6].mxu1 %v262_v19 }
  0x5d   : > { %711 = vmatprep.mubr.f32.mxu1 %v13424_v4 }
  0x5e   : > { %637 = vmatmul.mubr.f32.gmra.mrb[10].mxu0 %v13428_v8 }
  0x5f   : > { %12106 = vmatprep.mubr.msk.f32.mxu0 %vm13284_vm1, %v13283_v0 }
  0x60   : > { %713 = vmatmul.mubr.f32.vlgmr.msra.gmra.mrb[8].mxu1 %v13426_v6 }
  0x61   : > { %718 = vmatprep.mubr.f32.mxu1 %v13430_v9 }
  0x64   : > { %720 = vmatmul.mubr.f32.gmra.mrb[10].mxu1 %v13428_v8 }
  0x65   : > { %12136 = vmatprep.mubr.msk.f32.mxu1 %vm13284_vm1, %v13283_v0 }
  0xca   : > { %v734_v36 = vpop.xlane.xlu0 %733 }
  0xcb   : > { %v738_v37 = vadd.f32 %v734_v36, %v730_v35 }
  0xcd   : > { %741 = vst.msk [vmem:[#allocation3] sm:$0xff] %vm162_vm0, %v738_v37 }
  0xce   : > { %v737_v39 = vpop.xlane.xlu0 %736 }
  0xcf   : > { %v739_v40 = vadd.f32 %v737_v39, %v731_v38 }
  0xd1   : > { %742 = vst.msk [vmem:[#allocation3 + $0x8] sm:$0xff] %vm162_vm0, %v739_v40 }
  0xd4   : > { %v747_v41 = vld [vmem:[#allocation3] sm:$0xff] }
  0xd5   : > { %v755_v42 = vsel %vm162_vm0, %v747_v41, 0  ;;  %v13511_v41 = vsel %vm13504_vm3, 1.0, %v13283_v0 }
  0xd6   : > { %v758_v43 = vand.u32 4294901760, %v755_v42 }
  0xd8   : > { %12105 = vmatpush3.xpose.msra.mxu0 %v758_v43  ;;  %v749_v44 = vld [vmem:[#allocation3 + $0x8] sm:$0xff]  ;;  %v824_v45 = vsub.f32 %v755_v42, %v758_v43 }
  0xd9   : > { %v1204_v46 = vsel %vm162_vm0, %v749_v44, 0  ;;  %12109 = vmatprep.subr.mxu0 %v13283_v0 }
  0xda   : > { %v1207_v47 = vand.u32 4294901760, %v1204_v46  ;;  %v825_v48 = vand.u32 4294901760, %v824_v45 }
  0xdc   : > { %12135 = vmatpush3.xpose.msra.mxu1 %v1207_v47  ;;  %v826_v49 = vsub.f32 %v824_v45, %v825_v48  ;;  %v1273_v50 = vsub.f32 %v1204_v46, %v1207_v47 }
  0xdd   : > { %12139 = vmatprep.subr.mxu1 %v13283_v0 }
  0xde   : > { %v827_v51 = vand.u32 4294901760, %v826_v49  ;;  %v1274_v52 = vand.u32 4294901760, %v1273_v50 }
  0xe0   : > { %12107 = vmatmul.mubr.f32.vlgmr.msra.gmra.mrb[12].mxu0 %v827_v51  ;;  %v1275_v53 = vsub.f32 %v1273_v50, %v1274_v52 }
  0xe1   : > { %12110 = vmatpush3.xpose.msra.mxu0 %v827_v51  ;;  %12111 = vmatprep.mubr.msk.f32.mxu0 %vm13284_vm1, %v13283_v0 }
  0xe2   : > { %v1276_v54 = vand.u32 4294901760, %v1275_v53  ;;  %12114 = vmatprep.subr.mxu0 %v13283_v0 }
  0xe4   : > { %12137 = vmatmul.mubr.f32.vlgmr.msra.gmra.mrb[12].mxu1 %v1276_v54 }
  0xe5   : > { %12140 = vmatpush3.xpose.msra.mxu1 %v1276_v54  ;;  %12141 = vmatprep.mubr.msk.f32.mxu1 %vm13284_vm1, %v13283_v0 }
  0xe6   : > { %12144 = vmatprep.subr.mxu1 %v13283_v0 }
  0xe8   : > { %12112 = vmatmul.mubr.f32.vlgmr.msra.gmra.mrb[12].mxu0 %v758_v43 }
  0xe9   : > { %12115 = vmatpush3.xpose.msra.mxu0 %v824_v45  ;;  %12116 = vmatprep.mubr.msk.f32.mxu0 %vm13284_vm1, %v13283_v0 }
  0xea   : > { %12119 = vmatprep.subr.mxu0 %v13283_v0 }
  0xec   : > { %12142 = vmatmul.mubr.f32.vlgmr.msra.gmra.mrb[12].mxu1 %v1207_v47 }
  0xed   : > { %12145 = vmatpush3.xpose.msra.mxu1 %v1273_v50  ;;  %12146 = vmatprep.mubr.msk.f32.mxu1 %vm13284_vm1, %v13283_v0 }
  0xee   : > { %12149 = vmatprep.subr.mxu1 %v13283_v0 }
  0xf0   : > { %12117 = vmatmul.mubr.f32.vlgmr.msra.gmra.mrb[12].mxu0 %v824_v45 }
  0xf1   : > { %12120 = vmatpush3.xpose.msra.mxu0 %v758_v43  ;;  %12121 = vmatprep.mubr.msk.f32.mxu0 %vm13284_vm1, %v13283_v0 }
  0xf2   : > { %12124 = vmatprep.subr.mxu0 %v13283_v0 }
  0xf4   : > { %12147 = vmatmul.mubr.f32.vlgmr.msra.gmra.mrb[12].mxu1 %v1273_v50 }
  0xf5   : > { %12150 = vmatpush3.xpose.msra.mxu1 %v1207_v47  ;;  %12151 = vmatprep.mubr.msk.f32.mxu1 %vm13284_vm1, %v13283_v0 }
  0xf6   : > { %12154 = vmatprep.subr.mxu1 %v13283_v0 }
  0xf8   : > { %12122 = vmatmul.mubr.f32.vlgmr.msra.gmra.mrb[12].mxu0 %v825_v48 }
  0xf9   : > { %12125 = vmatpush3.xpose.msra.mxu0 %v825_v48  ;;  %12126 = vmatprep.mubr.msk.f32.mxu0 %vm13284_vm1, %v13283_v0 }
  0xfa   : > { %12129 = vmatprep.subr.mxu0 %v13283_v0 }
  0xfc   : > { %12152 = vmatmul.mubr.f32.vlgmr.msra.gmra.mrb[12].mxu1 %v1274_v52 }
  0xfd   : > { %12155 = vmatpush3.xpose.msra.mxu1 %v1274_v52  ;;  %12156 = vmatprep.mubr.msk.f32.mxu1 %vm13284_vm1, %v13283_v0 }
  0xfe   : > { %12159 = vmatprep.subr.mxu1 %v13283_v0 }
 0x100   : > { %12127 = vmatmul.mubr.f32.vlgmr.msra.gmra.mrb[12].mxu0 %v758_v43 }
 0x101   : > { %12130 = vmatpush3.xpose.msra.mxu0 %v758_v43  ;;  %12131 = vmatprep.mubr.msk.f32.mxu0 %vm13284_vm1, %v13283_v0 }
 0x102   : > { %12164 = vmatprep.subr.mxu0 %v13283_v0 }
 0x104   : > { %12157 = vmatmul.mubr.f32.vlgmr.msra.gmra.mrb[12].mxu1 %v1207_v47 }
 0x105   : > { %12160 = vmatpush3.xpose.msra.mxu1 %v1207_v47  ;;  %12161 = vmatprep.mubr.msk.f32.mxu1 %vm13284_vm1, %v13283_v0 }
 0x106   : > { %12194 = vmatprep.subr.mxu1 %v13283_v0 }
 0x108   : > { %12132 = vmatmul.mubr.f32.vlgmr.msra.gmra.mrb[12].mxu0 %v758_v43 }
 0x109   : > { %12166 = vmatprep.mubr.msk.f32.mxu0 %vm13284_vm1, %v13283_v0 }
 0x10c   : > { %12162 = vmatmul.mubr.f32.vlgmr.msra.gmra.mrb[12].mxu1 %v1207_v47 }
 0x10d   : > { %12196 = vmatprep.mubr.msk.f32.mxu1 %vm13284_vm1, %v13283_v0 }
 0x11b   : > { %v251_v55 = vpop.f32.mrb[0].mxu0 }
 0x11c   : > { %v253_v56 = vpop.f32.mrb[1].mxu0 }
 0x11f   : > { %v266_v57 = vpop.f32.mrb[2].mxu0 }
 0x120   : > { %v268_v58 = vpop.f32.mrb[3].mxu0 }
 0x123   : > { %v358_v59 = vpop.f32.mrb[0].mxu1  ;;  %v447_v60 = vpop.f32.mrb[4].mxu0 }
 0x124   : > { %v359_v61 = vadd.f32 %v358_v59, %v251_v55  ;;  %v360_v62 = vpop.f32.mrb[1].mxu1  ;;  %v449_v63 = vpop.f32.mrb[5].mxu0 }
 0x126   : > { %v448_v1 = vadd.f32 %v447_v60, %v359_v61 }
 0x127   : > { %v365_v2 = vpop.f32.mrb[2].mxu1  ;;  %v456_v3 = vpop.f32.mrb[6].mxu0 }
 0x128   : > { %v366_v4 = vadd.f32 %v365_v2, %v266_v57  ;;  %v367_v5 = vpop.f32.mrb[3].mxu1  ;;  %v458_v6 = vpop.f32.mrb[7].mxu0  ;;  %v1702_v2 = vsel %vm1668_vm4, %v13511_v41, 0 }
 0x12a   : > { %v457_v7 = vadd.f32 %v456_v3, %v366_v4  ;;  %v1771_v4 = vsub.f32 %v1702_v2, %v1702_v2 }
 0x12b   : > { %v536_v8 = vpop.f32.mrb[4].mxu1 }
 0x12c   : > { %v537_v9 = vadd.f32 %v536_v8, %v448_v1  ;;  %v538_v10 = vpop.f32.mrb[5].mxu1  ;;  %v1772_v5 = vand.u32 4294901760, %v1771_v4 }
 0x12d   : > { %v631_v11 = vpop.f32.mrb[8].mxu0 }
 0x12e   : > { %v632_v12 = vadd.f32 %v631_v11, %v537_v9  ;;  %v633_v13 = vpop.f32.mrb[9].mxu0  ;;  %v1773_v9 = vsub.f32 %v1771_v4, %v1772_v5 }
 0x12f   : > { %v547_v14 = vpop.f32.mrb[6].mxu1 }
 0x130   : > { %v548_v15 = vadd.f32 %v547_v14, %v457_v7  ;;  %v549_v16 = vpop.f32.mrb[7].mxu1  ;;  %v1774_v13 = vand.u32 4294901760, %v1773_v9 }
 0x131   : > { %v638_v17 = vpop.f32.mrb[10].mxu0 }
 0x132   : > { %v639_v18 = vadd.f32 %v638_v17, %v548_v15  ;;  %v640_v19 = vpop.f32.mrb[11].mxu0 }
 0x133   : > { %v714_v21 = vpop.f32.mrb[8].mxu1 }
 0x134   : > { %v715_v22 = vadd.f32 %v714_v21, %v632_v12  ;;  %v716_v23 = vpop.f32.mrb[9].mxu1 }
 0x136   : > { %v725_v24 = vadd.f32 %v715_v22, %v169_v20 }
 0x137   : > { %v721_v26 = vpop.f32.mrb[10].mxu1 }
 0x138   : > { %728 = vst.msk [vmem:[#allocation2] sm:$0xff] %vm159_vm2, %v725_v24  ;;  %v722_v27 = vadd.f32 %v721_v26, %v639_v18  ;;  %v723_v28 = vpop.f32.mrb[11].mxu1 }
 0x139   : > { %v13286_v28 = vmov 1.0  }
 0x13a   : > { %v726_v29 = vadd.f32 %v722_v27, %v170_v25 }
 0x13c   : > { %729 = vst.msk [vmem:[#allocation2 + $0x8] sm:$0xff] %vm159_vm2, %v726_v29  ;;  %v13584_v29 = vmul.f32 3.0, %v13511_v41 }
 0x13f   : > { %v746_v38 = vld [vmem:[#allocation2] sm:$0xff] }
 0x143   : > { %v748_v30 = vld [vmem:[#allocation2 + $0x8] sm:$0xff] }
 0x144   : > { %751 = vrot.lane.b32.xlu1 %v748_v30, %s13285_s18 }
 0x1b6   : > { %v752_v45 = vpop.permute.xlu1 %751 }
 0x1db   : > { %v1199_v34 = vpop.f32.mrb[12].mxu0 }
 0x1dc   : > { %v1652_v35 = vmul.f32 0.00390625, %v1199_v34  ;;  %v12133_v36 = vpop.f32.mrb[13].mxu0  ;;  %v2685_v34 = vsub.f32 %v13511_v41, %v13511_v41 }
 0x1de   : > { %v1654_v39 = vsub.f32 %v746_v38, %v1652_v35 }
 0x1df   : > { %v1648_v40 = vpop.f32.mrb[12].mxu1 }
 0x1e0   : > { %v1656_v42 = vmul.f32 0.00390625, %v1654_v39  ;;  %v1653_v43 = vmul.f32 0.00390625, %v1648_v40  ;;  %v12163_v44 = vpop.f32.mrb[13].mxu1 }
 0x1e1   : > { %v2686_v44 = vand.u32 4294901760, %v2685_v34 }
 0x1e2   : > { %v1655_v46 = vsub.f32 %v752_v45, %v1653_v43  ;;  %v1666_v47 = vmul.f32 %v13511_v41, %v1656_v42 }
 0x1e4   : > { %v1657_v48 = vmul.f32 0.00390625, %v1655_v46  ;;  %v1669_v49 = vsel %vm1668_vm4, %v1666_v47, 0.0 }
 0x1e5   : > { %1670 = vadd.xlane.f32.xlu1 %v1669_v49 }
 0x1e6   : > { %v1667_v50 = vmul.f32 %v13511_v41, %v1657_v48 }
 0x1e8   : > { %v1672_v51 = vsel %vm1668_vm4, %v1667_v50, 0.0  ;;  %v2687_v50 = vsub.f32 %v2685_v34, %v2686_v44 }
 0x1e9   : > { %1673 = vadd.xlane.f32.xlu0 %v1672_v51 }
 0x272   : > { %v1671_v52 = vpop.xlane.xlu1 %1670 }
 0x273   : > { %v1675_v53 = vrot.slane %v1671_v52, 4 }
 0x275   : > { %v1676_v54 = vadd.f32 %v1675_v53, %v1671_v52 }
 0x276   : > { %v1674_v55 = vpop.xlane.xlu0 %1673 }
 0x277   : > { %v1677_v56 = vrot.slane %v1676_v54, 2  ;;  %v1681_v57 = vrot.slane %v1674_v55, 4 }
 0x279   : > { %v1678_v58 = vadd.f32 %v1677_v56, %v1676_v54  ;;  %v1682_v59 = vadd.f32 %v1681_v57, %v1674_v55  ;;  %v2688_v55 = vand.u32 4294901760, %v2687_v50 }
 0x27b   : > { %v1679_v60 = vrot.slane %v1678_v58, 1  ;;  %v1683_v61 = vrot.slane %v1682_v59, 2 }
 0x27d   : > { %v1680_v62 = vadd.f32 %v1679_v60, %v1678_v58  ;;  %v1684_v63 = vadd.f32 %v1683_v61, %v1682_v59 }
 0x27f   : > { %13158 = vrcp.f32 %v1680_v62  ;;  %v1685_v1 = vrot.slane %v1684_v63, 1 }
 0x281   : > { %v1686_v3 = vadd.f32 %v1685_v1, %v1684_v63 }
 0x283   : > { %13160 = vrcp.f32 %v1686_v3 }
 0x289   : > { %v13159_v6 = vpop.eup %13158 }
 0x28a   : > { %vm1691_vm5 = vcmp.lt.f32.partialorder %v13159_v6, 0.0  ;;  %v1693_v7 = vceil.f32 %v13159_v6  ;;  %v1695_v8 = vfloor.f32 %v13159_v6 }
 0x28c   : > { %v1697_v10 = vsel %vm1691_vm5, %v1693_v7, %v1695_v8 }
 0x28d   : > { %v13161_v11 = vpop.eup %13160  ;;  %v13519_v12 = vmul.f32 %v1697_v10, %v1656_v42 }
 0x28e   : > { %vm1692_vm6 = vcmp.lt.f32.partialorder %v13161_v11, 0.0  ;;  %v1694_v14 = vceil.f32 %v13161_v11  ;;  %v1696_v15 = vfloor.f32 %v13161_v11 }
 0x28f   : > { %v1705_v16 = vand.u32 4294901760, %v13519_v12  ;;  %v2598_v32 = vmul.f32 0.5, %v13519_v12 }
 0x290   : > { %v1698_v17 = vsel %vm1692_vm6, %v1694_v14, %v1696_v15 }
 0x291   : > { %12165 = vmatpush3.msra.mxu0 %v1705_v16  ;;  %v13522_v18 = vmul.f32 %v1698_v17, %v1657_v48  ;;  %v1782_v19 = vsub.f32 %v13519_v12, %v1705_v16 }
 0x292   : > { %12167 = vmatmul.mubr.f32.vlgmr.msra.gmra.mrb[14].mxu0 %v1774_v13  ;;  %12169 = vmatprep.subr.mxu0 %v13283_v0 }
 0x293   : > { %v2151_v20 = vand.u32 4294901760, %v13522_v18  ;;  %v1783_v21 = vand.u32 4294901760, %v1782_v19  ;;  %12171 = vmatprep.mubr.msk.f32.mxu0 %vm13284_vm1, %v13283_v0  ;;  %v2599_v42 = vmul.f32 0.5, %v13522_v18 }
 0x295   : > { %12195 = vmatpush3.msra.mxu1 %v2151_v20  ;;  %v1784_v22 = vsub.f32 %v1782_v19, %v1783_v21  ;;  %v2228_v23 = vsub.f32 %v13522_v18, %v2151_v20 }
 0x296   : > { %12197 = vmatmul.mubr.f32.vlgmr.msra.gmra.mrb[14].mxu1 %v1774_v13  ;;  %12199 = vmatprep.subr.mxu1 %v13283_v0 }
 0x297   : > { %v1785_v24 = vand.u32 4294901760, %v1784_v22  ;;  %v2229_v25 = vand.u32 4294901760, %v2228_v23  ;;  %12201 = vmatprep.mubr.msk.f32.mxu1 %vm13284_vm1, %v13283_v0 }
 0x299   : > { %12170 = vmatpush3.msra.mxu0 %v1785_v24  ;;  %v2230_v26 = vsub.f32 %v2228_v23, %v2229_v25 }
 0x29a   : > { %12172 = vmatmul.mubr.msk.f32.vlgmr.msra.gmra.mrb[14].mxu0 %vm1668_vm4, %v13511_v41  ;;  %12174 = vmatprep.subr.mxu0 %v13283_v0 }
 0x29b   : > { %12175 = vmatpush3.msra.mxu0 %v1782_v19  ;;  %v2231_v27 = vand.u32 4294901760, %v2230_v26  ;;  %12176 = vmatprep.mubr.msk.f32.mxu0 %vm13284_vm1, %v13283_v0 }
 0x29c   : > { %12179 = vmatprep.subr.mxu0 %v13283_v0 }
 0x29d   : > { %12200 = vmatpush3.msra.mxu1 %v2231_v27 }
 0x29e   : > { %12202 = vmatmul.mubr.msk.f32.vlgmr.msra.gmra.mrb[14].mxu1 %vm1668_vm4, %v13511_v41  ;;  %12204 = vmatprep.subr.mxu1 %v13283_v0 }
 0x29f   : > { %12205 = vmatpush3.msra.mxu1 %v2228_v23  ;;  %12206 = vmatprep.mubr.msk.f32.mxu1 %vm13284_vm1, %v13283_v0 }
 0x2a0   : > { %12209 = vmatprep.subr.mxu1 %v13283_v0 }
 0x2a2   : > { %12177 = vmatmul.mubr.f32.vlgmr.msra.gmra.mrb[14].mxu0 %v1771_v4 }
 0x2a3   : > { %12180 = vmatpush3.msra.mxu0 %v1705_v16  ;;  %12181 = vmatprep.mubr.msk.f32.mxu0 %vm13284_vm1, %v13283_v0 }
 0x2a4   : > { %12184 = vmatprep.subr.mxu0 %v13283_v0 }
 0x2a6   : > { %12207 = vmatmul.mubr.f32.vlgmr.msra.gmra.mrb[14].mxu1 %v1771_v4 }
 0x2a7   : > { %12210 = vmatpush3.msra.mxu1 %v2151_v20  ;;  %12211 = vmatprep.mubr.msk.f32.mxu1 %vm13284_vm1, %v13283_v0 }
 0x2a8   : > { %12214 = vmatprep.subr.mxu1 %v13283_v0 }
 0x2aa   : > { %12182 = vmatmul.mubr.f32.vlgmr.msra.gmra.mrb[14].mxu0 %v1772_v5 }
 0x2ab   : > { %12185 = vmatpush3.msra.mxu0 %v1783_v21  ;;  %12186 = vmatprep.mubr.msk.f32.mxu0 %vm13284_vm1, %v13283_v0 }
 0x2ac   : > { %12189 = vmatprep.subr.mxu0 %v13283_v0 }
 0x2ae   : > { %12212 = vmatmul.mubr.f32.vlgmr.msra.gmra.mrb[14].mxu1 %v1772_v5 }
 0x2af   : > { %12215 = vmatpush3.msra.mxu1 %v2229_v25  ;;  %12216 = vmatprep.mubr.msk.f32.mxu1 %vm13284_vm1, %v13283_v0 }
 0x2b0   : > { %12219 = vmatprep.subr.mxu1 %v13283_v0 }
 0x2b2   : > { %12187 = vmatmul.mubr.msk.f32.vlgmr.msra.gmra.mrb[14].mxu0 %vm1668_vm4, %v13511_v41 }
 0x2b3   : > { %12190 = vmatpush3.msra.mxu0 %v1705_v16  ;;  %12191 = vmatprep.mubr.msk.f32.mxu0 %vm13284_vm1, %v13283_v0 }
 0x2b4   : > { %12224 = vmatprep.subr.mxu0 %v13283_v0 }
 0x2b6   : > { %12217 = vmatmul.mubr.msk.f32.vlgmr.msra.gmra.mrb[14].mxu1 %vm1668_vm4, %v13511_v41 }
 0x2b7   : > { %12220 = vmatpush3.msra.mxu1 %v2151_v20  ;;  %12221 = vmatprep.mubr.msk.f32.mxu1 %vm13284_vm1, %v13283_v0 }
 0x2b8   : > { %12254 = vmatprep.subr.mxu1 %v13283_v0 }
 0x2ba   : > { %12192 = vmatmul.mubr.msk.f32.vlgmr.msra.gmra.mrb[14].mxu0 %vm1668_vm4, %v13511_v41 }
 0x2bb   : > { %12226 = vmatprep.mubr.msk.f32.mxu0 %vm13284_vm1, %v13283_v0  ;;  %12225 = vmatpush3.msk.msra.mxu0 %vm13504_vm3, %v13286_v28 }
 0x2bc   : > { %12229 = vmatprep.subr.mxu0 %v13283_v0 }
 0x2be   : > { %12222 = vmatmul.mubr.msk.f32.vlgmr.msra.gmra.mrb[14].mxu1 %vm1668_vm4, %v13511_v41 }
 0x2bf   : > { %12256 = vmatprep.mubr.msk.f32.mxu1 %vm13284_vm1, %v13283_v0  ;;  %12255 = vmatpush3.msk.msra.mxu1 %vm13504_vm3, %v13286_v28 }
 0x2c0   : > { %12259 = vmatprep.subr.mxu1 %v13283_v0 }
 0x38d   : > { %v2146_v30 = vpop.f32.mrb[14].mxu0 }
 0x38e   : > { %v2596_v31 = vsub.f32 %v13584_v29, %v2146_v30  ;;  %v12193_v33 = vpop.f32.mrb[15].mxu0 }
 0x390   : > { %v13590_v35 = vmul.f32 %v2598_v32, %v2596_v31  ;;  %v2602_v36 = vmul.f32 0.5, %v2596_v31 }
 0x391   : > { %v2592_v38 = vpop.f32.mrb[14].mxu1 }
 0x392   : > { %v2605_v39 = vsel %vm1668_vm4, %v2602_v36, 0  ;;  %v2597_v40 = vsub.f32 %v13584_v29, %v2592_v38  ;;  %v12223_v43 = vpop.f32.mrb[15].mxu1  ;;  %v13641_v60 = vand.u32 4294901760, %v13590_v35  ;;  %v4402_v26 = vmul.f32 0.5, %v13590_v35 }
 0x393   : > { %v2673_v45 = vand.u32 4294901760, %v2605_v39 }
 0x394   : > { %v13595_v46 = vmul.f32 %v2599_v42, %v2597_v40  ;;  %v2603_v47 = vmul.f32 0.5, %v2597_v40  ;;  %v3583_v37 = vsub.f32 %v13590_v35, %v13641_v60 }
 0x395   : > { %v2674_v48 = vsub.f32 %v2605_v39, %v2673_v45 }
 0x396   : > { %v3054_v49 = vsel %vm1668_vm4, %v2603_v47, 0  ;;  %v13648_v61 = vand.u32 4294901760, %v13595_v46  ;;  %v3584_v4 = vand.u32 4294901760, %v3583_v37  ;;  %v4403_v36 = vmul.f32 0.5, %v13595_v46 }
 0x397   : > { %v3122_v51 = vand.u32 4294901760, %v3054_v49  ;;  %v2675_v52 = vand.u32 4294901760, %v2674_v48 }
 0x398   : > { %v4032_v3 = vsub.f32 %v13595_v46, %v13648_v61  ;;  %v3585_v11 = vsub.f32 %v3583_v37, %v3584_v4 }
 0x399   : > { %v3123_v53 = vsub.f32 %v3054_v49, %v3122_v51  ;;  %v2676_v54 = vsub.f32 %v2674_v48, %v2675_v52 }
 0x39a   : > { %v4033_v12 = vand.u32 4294901760, %v4032_v3  ;;  %v3586_v17 = vand.u32 4294901760, %v3585_v11 }
 0x39b   : > { %v2677_v56 = vand.u32 4294901760, %v2676_v54  ;;  %v3124_v57 = vand.u32 4294901760, %v3123_v53 }
 0x39c   : > { %v4034_v18 = vsub.f32 %v4032_v3, %v4033_v12 }
 0x39d   : > { %12227 = vmatmul.mubr.f32.vlgmr.msra.gmra.mrb[16].mxu0 %v2677_v56  ;;  %v3125_v58 = vsub.f32 %v3123_v53, %v3124_v57 }
 0x39e   : > { %12230 = vmatpush3.msra.mxu0 %v2688_v55  ;;  %12231 = vmatprep.mubr.msk.f32.mxu0 %vm13284_vm1, %v13283_v0  ;;  %v4035_v21 = vand.u32 4294901760, %v4034_v18 }
 0x39f   : > { %v3126_v59 = vand.u32 4294901760, %v3125_v58  ;;  %12234 = vmatprep.subr.mxu0 %v13283_v0 }
 0x3a1   : > { %12257 = vmatmul.mubr.f32.vlgmr.msra.gmra.mrb[16].mxu1 %v3126_v59 }
 0x3a2   : > { %12260 = vmatpush3.msra.mxu1 %v2688_v55  ;;  %12261 = vmatprep.mubr.msk.f32.mxu1 %vm13284_vm1, %v13283_v0 }
 0x3a3   : > { %12264 = vmatprep.subr.mxu1 %v13283_v0 }
 0x3a5   : > { %12232 = vmatmul.mubr.f32.vlgmr.msra.gmra.mrb[16].mxu0 %v2673_v45 }
 0x3a6   : > { %12235 = vmatpush3.msra.mxu0 %v2685_v34  ;;  %12236 = vmatprep.mubr.msk.f32.mxu0 %vm13284_vm1, %v13283_v0 }
 0x3a7   : > { %12239 = vmatprep.subr.mxu0 %v13283_v0 }
 0x3a9   : > { %12262 = vmatmul.mubr.f32.vlgmr.msra.gmra.mrb[16].mxu1 %v3122_v51 }
 0x3aa   : > { %12265 = vmatpush3.msra.mxu1 %v2685_v34  ;;  %12266 = vmatprep.mubr.msk.f32.mxu1 %vm13284_vm1, %v13283_v0 }
 0x3ab   : > { %12269 = vmatprep.subr.mxu1 %v13283_v0 }
 0x3ad   : > { %12237 = vmatmul.mubr.f32.vlgmr.msra.gmra.mrb[16].mxu0 %v2674_v48 }
 0x3ae   : > { %12240 = vmatpush3.msk.msra.mxu0 %vm13504_vm3, %v13286_v28  ;;  %12241 = vmatprep.mubr.msk.f32.mxu0 %vm13284_vm1, %v13283_v0 }
 0x3af   : > { %12244 = vmatprep.subr.mxu0 %v13283_v0 }
 0x3b1   : > { %12267 = vmatmul.mubr.f32.vlgmr.msra.gmra.mrb[16].mxu1 %v3123_v53 }
 0x3b2   : > { %12270 = vmatpush3.msk.msra.mxu1 %vm13504_vm3, %v13286_v28  ;;  %12271 = vmatprep.mubr.msk.f32.mxu1 %vm13284_vm1, %v13283_v0 }
 0x3b3   : > { %12274 = vmatprep.subr.mxu1 %v13283_v0 }
 0x3b5   : > { %12242 = vmatmul.mubr.f32.vlgmr.msra.gmra.mrb[16].mxu0 %v2675_v52 }
 0x3b6   : > { %12245 = vmatpush3.msra.mxu0 %v2686_v44  ;;  %12246 = vmatprep.mubr.msk.f32.mxu0 %vm13284_vm1, %v13283_v0 }
 0x3b7   : > { %12249 = vmatprep.subr.mxu0 %v13283_v0 }
 0x3b9   : > { %12272 = vmatmul.mubr.f32.vlgmr.msra.gmra.mrb[16].mxu1 %v3124_v57 }
 0x3ba   : > { %12275 = vmatpush3.msra.mxu1 %v2686_v44  ;;  %12276 = vmatprep.mubr.msk.f32.mxu1 %vm13284_vm1, %v13283_v0 }
 0x3bb   : > { %12279 = vmatprep.subr.mxu1 %v13283_v0 }
 0x3bd   : > { %12247 = vmatmul.mubr.f32.vlgmr.msra.gmra.mrb[16].mxu0 %v2673_v45 }
 0x3be   : > { %12250 = vmatpush3.msk.msra.mxu0 %vm13504_vm3, %v13286_v28  ;;  %12251 = vmatprep.mubr.msk.f32.mxu0 %vm13284_vm1, %v13283_v0 }
 0x3bf   : > { %12284 = vmatprep.subr.mxu0 %v13283_v0 }
 0x3c1   : > { %12277 = vmatmul.mubr.f32.vlgmr.msra.gmra.mrb[16].mxu1 %v3122_v51 }
 0x3c2   : > { %12280 = vmatpush3.msk.msra.mxu1 %vm13504_vm3, %v13286_v28  ;;  %12281 = vmatprep.mubr.msk.f32.mxu1 %vm13284_vm1, %v13283_v0 }
 0x3c3   : > { %12314 = vmatprep.subr.mxu1 %v13283_v0 }
 0x3c5   : > { %12252 = vmatmul.mubr.f32.vlgmr.msra.gmra.mrb[16].mxu0 %v2673_v45 }
 0x3c6   : > { %12285 = vmatpush3.msra.mxu0 %v13641_v60  ;;  %12286 = vmatprep.mubr.msk.f32.mxu0 %vm13284_vm1, %v13283_v0 }
 0x3c7   : > { %12289 = vmatprep.subr.mxu0 %v13283_v0 }
 0x3c9   : > { %12282 = vmatmul.mubr.f32.vlgmr.msra.gmra.mrb[16].mxu1 %v3122_v51 }
 0x3ca   : > { %12315 = vmatpush3.msra.mxu1 %v13648_v61  ;;  %12316 = vmatprep.mubr.msk.f32.mxu1 %vm13284_vm1, %v13283_v0 }
 0x3cb   : > { %12319 = vmatprep.subr.mxu1 %v13283_v0 }
 0x498   : > { %v13656_v62 = vpop.f32.mrb[16].mxu0 }
 0x499   : > { %v3503_v63 = vsel %vm1668_vm4, %v13656_v62, 0  ;;  %v12253_v1 = vpop.f32.mrb[17].mxu0  ;;  %v13701_v22 = vand.u32 4294901760, %v13656_v62 }
 0x49a   : > { %v3571_v2 = vand.u32 4294901760, %v3503_v63 }
 0x49b   : > { %v4489_v28 = vsub.f32 %v13656_v62, %v13701_v22 }
 0x49c   : > { %v3572_v5 = vsub.f32 %v3503_v63, %v3571_v2  ;;  %v13662_v6 = vpop.f32.mrb[16].mxu1 }
 0x49d   : > { %v3952_v7 = vsel %vm1668_vm4, %v13662_v6, 0  ;;  %v12283_v8 = vpop.f32.mrb[17].mxu1  ;;  %v13708_v23 = vand.u32 4294901760, %v13662_v6  ;;  %v4490_v40 = vand.u32 4294901760, %v4489_v28 }
 0x49e   : > { %v3573_v9 = vand.u32 4294901760, %v3572_v5  ;;  %v4020_v10 = vand.u32 4294901760, %v3952_v7 }
 0x49f   : > { %v4938_v35 = vsub.f32 %v13662_v6, %v13708_v23  ;;  %v4491_v50 = vsub.f32 %v4489_v28, %v4490_v40 }
 0x4a0   : > { %v4021_v13 = vsub.f32 %v3952_v7, %v4020_v10  ;;  %v3574_v14 = vsub.f32 %v3572_v5, %v3573_v9 }
 0x4a1   : > { %v4939_v49 = vand.u32 4294901760, %v4938_v35  ;;  %v4492_v54 = vand.u32 4294901760, %v4491_v50 }
 0x4a2   : > { %v4022_v15 = vand.u32 4294901760, %v4021_v13  ;;  %v3575_v16 = vand.u32 4294901760, %v3574_v14 }
 0x4a3   : > { %v4940_v55 = vsub.f32 %v4938_v35, %v4939_v49 }
 0x4a4   : > { %12287 = vmatmul.mubr.f32.vlgmr.msra.gmra.mrb[18].mxu0 %v3575_v16  ;;  %v4023_v19 = vsub.f32 %v4021_v13, %v4022_v15 }
 0x4a5   : > { %12290 = vmatpush3.msra.mxu0 %v3586_v17  ;;  %12291 = vmatprep.mubr.msk.f32.mxu0 %vm13284_vm1, %v13283_v0  ;;  %v4941_v58 = vand.u32 4294901760, %v4940_v55 }
 0x4a6   : > { %v4024_v20 = vand.u32 4294901760, %v4023_v19  ;;  %12294 = vmatprep.subr.mxu0 %v13283_v0 }
 0x4a8   : > { %12317 = vmatmul.mubr.f32.vlgmr.msra.gmra.mrb[18].mxu1 %v4024_v20 }
 0x4a9   : > { %12320 = vmatpush3.msra.mxu1 %v4035_v21  ;;  %12321 = vmatprep.mubr.msk.f32.mxu1 %vm13284_vm1, %v13283_v0 }
 0x4aa   : > { %12324 = vmatprep.subr.mxu1 %v13283_v0 }
 0x4ac   : > { %12292 = vmatmul.mubr.f32.vlgmr.msra.gmra.mrb[18].mxu0 %v3571_v2 }
 0x4ad   : > { %12295 = vmatpush3.msra.mxu0 %v3583_v37  ;;  %12296 = vmatprep.mubr.msk.f32.mxu0 %vm13284_vm1, %v13283_v0 }
 0x4ae   : > { %12299 = vmatprep.subr.mxu0 %v13283_v0 }
 0x4b0   : > { %12322 = vmatmul.mubr.f32.vlgmr.msra.gmra.mrb[18].mxu1 %v4020_v10 }
 0x4b1   : > { %12325 = vmatpush3.msra.mxu1 %v4032_v3  ;;  %12326 = vmatprep.mubr.msk.f32.mxu1 %vm13284_vm1, %v13283_v0 }
 0x4b2   : > { %12329 = vmatprep.subr.mxu1 %v13283_v0 }
 0x4b4   : > { %12297 = vmatmul.mubr.f32.vlgmr.msra.gmra.mrb[18].mxu0 %v3572_v5 }
 0x4b5   : > { %12300 = vmatpush3.msra.mxu0 %v13641_v60  ;;  %12301 = vmatprep.mubr.msk.f32.mxu0 %vm13284_vm1, %v13283_v0 }
 0x4b6   : > { %12304 = vmatprep.subr.mxu0 %v13283_v0 }
 0x4b8   : > { %12327 = vmatmul.mubr.f32.vlgmr.msra.gmra.mrb[18].mxu1 %v4021_v13 }
 0x4b9   : > { %12330 = vmatpush3.msra.mxu1 %v13648_v61  ;;  %12331 = vmatprep.mubr.msk.f32.mxu1 %vm13284_vm1, %v13283_v0 }
 0x4ba   : > { %12334 = vmatprep.subr.mxu1 %v13283_v0 }
 0x4bc   : > { %12302 = vmatmul.mubr.f32.vlgmr.msra.gmra.mrb[18].mxu0 %v3573_v9 }
 0x4bd   : > { %12305 = vmatpush3.msra.mxu0 %v3584_v4  ;;  %12306 = vmatprep.mubr.msk.f32.mxu0 %vm13284_vm1, %v13283_v0 }
 0x4be   : > { %12309 = vmatprep.subr.mxu0 %v13283_v0 }
 0x4c0   : > { %12332 = vmatmul.mubr.f32.vlgmr.msra.gmra.mrb[18].mxu1 %v4022_v15 }
 0x4c1   : > { %12335 = vmatpush3.msra.mxu1 %v4033_v12  ;;  %12336 = vmatprep.mubr.msk.f32.mxu1 %vm13284_vm1, %v13283_v0 }
 0x4c2   : > { %12339 = vmatprep.subr.mxu1 %v13283_v0 }
 0x4c4   : > { %12307 = vmatmul.mubr.f32.vlgmr.msra.gmra.mrb[18].mxu0 %v3571_v2 }
 0x4c5   : > { %12310 = vmatpush3.msra.mxu0 %v13641_v60  ;;  %12311 = vmatprep.mubr.msk.f32.mxu0 %vm13284_vm1, %v13283_v0 }
 0x4c6   : > { %12344 = vmatprep.subr.mxu0 %v13283_v0 }
 0x4c8   : > { %12337 = vmatmul.mubr.f32.vlgmr.msra.gmra.mrb[18].mxu1 %v4020_v10 }
 0x4c9   : > { %12340 = vmatpush3.msra.mxu1 %v13648_v61  ;;  %12341 = vmatprep.mubr.msk.f32.mxu1 %vm13284_vm1, %v13283_v0 }
 0x4ca   : > { %12374 = vmatprep.subr.mxu1 %v13283_v0 }
 0x4cc   : > { %12312 = vmatmul.mubr.f32.vlgmr.msra.gmra.mrb[18].mxu0 %v3571_v2 }
 0x4cd   : > { %12345 = vmatpush3.msra.mxu0 %v13701_v22  ;;  %12346 = vmatprep.mubr.msk.f32.mxu0 %vm13284_vm1, %v13283_v0 }
 0x4ce   : > { %12349 = vmatprep.subr.mxu0 %v13283_v0 }
 0x4d0   : > { %12342 = vmatmul.mubr.f32.vlgmr.msra.gmra.mrb[18].mxu1 %v4020_v10 }
 0x4d1   : > { %12375 = vmatpush3.msra.mxu1 %v13708_v23  ;;  %12376 = vmatprep.mubr.msk.f32.mxu1 %vm13284_vm1, %v13283_v0 }
 0x4d2   : > { %12379 = vmatprep.subr.mxu1 %v13283_v0 }
 0x59f   : > { %v3947_v24 = vpop.f32.mrb[18].mxu0 }
 0x5a0   : > { %v4400_v25 = vsub.f32 %v13584_v29, %v3947_v24  ;;  %v12313_v27 = vpop.f32.mrb[19].mxu0 }
 0x5a2   : > { %v13718_v30 = vmul.f32 %v4402_v26, %v4400_v25  ;;  %v4406_v31 = vmul.f32 0.5, %v4400_v25 }
 0x5a3   : > { %v4396_v32 = vpop.f32.mrb[18].mxu1 }
 0x5a4   : > { %v4409_v33 = vsel %vm1668_vm4, %v4406_v31, 0  ;;  %v4401_v34 = vsub.f32 %v13584_v29, %v4396_v32  ;;  %v12343_v38 = vpop.f32.mrb[19].mxu1  ;;  %v13763_v59 = vand.u32 4294901760, %v13718_v30  ;;  %v6206_v25 = vmul.f32 0.5, %v13718_v30 }
 0x5a5   : > { %v4477_v39 = vand.u32 4294901760, %v4409_v33 }
 0x5a6   : > { %v13725_v42 = vmul.f32 %v4403_v36, %v4401_v34  ;;  %v4407_v43 = vmul.f32 0.5, %v4401_v34  ;;  %v5387_v61 = vsub.f32 %v13718_v30, %v13763_v59 }
 0x5a7   : > { %v4478_v44 = vsub.f32 %v4409_v33, %v4477_v39 }
 0x5a8   : > { %v4858_v45 = vsel %vm1668_vm4, %v4407_v43, 0  ;;  %v13770_v60 = vand.u32 4294901760, %v13725_v42  ;;  %v5388_v3 = vand.u32 4294901760, %v5387_v61  ;;  %v6207_v36 = vmul.f32 0.5, %v13725_v42 }
 0x5a9   : > { %v4926_v47 = vand.u32 4294901760, %v4858_v45  ;;  %v4479_v48 = vand.u32 4294901760, %v4478_v44 }
 0x5aa   : > { %v5836_v2 = vsub.f32 %v13725_v42, %v13770_v60  ;;  %v5389_v10 = vsub.f32 %v5387_v61, %v5388_v3 }
 0x5ab   : > { %v4927_v51 = vsub.f32 %v4858_v45, %v4926_v47  ;;  %v4480_v52 = vsub.f32 %v4478_v44, %v4479_v48 }
 0x5ac   : > { %v5837_v11 = vand.u32 4294901760, %v5836_v2  ;;  %v5390_v16 = vand.u32 4294901760, %v5389_v10 }
 0x5ad   : > { %v4481_v53 = vand.u32 4294901760, %v4480_v52  ;;  %v4928_v46 = vand.u32 4294901760, %v4927_v51 }
 0x5ae   : > { %v5838_v17 = vsub.f32 %v5836_v2, %v5837_v11 }
 0x5af   : > { %12347 = vmatmul.mubr.f32.vlgmr.msra.gmra.mrb[20].mxu0 %v4481_v53  ;;  %v4929_v56 = vsub.f32 %v4927_v51, %v4928_v46 }
 0x5b0   : > { %12350 = vmatpush3.msra.mxu0 %v4492_v54  ;;  %12351 = vmatprep.mubr.msk.f32.mxu0 %vm13284_vm1, %v13283_v0  ;;  %v5839_v20 = vand.u32 4294901760, %v5838_v17 }
 0x5b1   : > { %v4930_v57 = vand.u32 4294901760, %v4929_v56  ;;  %12354 = vmatprep.subr.mxu0 %v13283_v0 }
 0x5b3   : > { %12377 = vmatmul.mubr.f32.vlgmr.msra.gmra.mrb[20].mxu1 %v4930_v57 }
 0x5b4   : > { %12380 = vmatpush3.msra.mxu1 %v4941_v58  ;;  %12381 = vmatprep.mubr.msk.f32.mxu1 %vm13284_vm1, %v13283_v0 }
 0x5b5   : > { %12384 = vmatprep.subr.mxu1 %v13283_v0 }
 0x5b7   : > { %12352 = vmatmul.mubr.f32.vlgmr.msra.gmra.mrb[20].mxu0 %v4477_v39 }
 0x5b8   : > { %12355 = vmatpush3.msra.mxu0 %v4489_v28  ;;  %12356 = vmatprep.mubr.msk.f32.mxu0 %vm13284_vm1, %v13283_v0 }
 0x5b9   : > { %12359 = vmatprep.subr.mxu0 %v13283_v0 }
 0x5bb   : > { %12382 = vmatmul.mubr.f32.vlgmr.msra.gmra.mrb[20].mxu1 %v4926_v47 }
 0x5bc   : > { %12385 = vmatpush3.msra.mxu1 %v4938_v35  ;;  %12386 = vmatprep.mubr.msk.f32.mxu1 %vm13284_vm1, %v13283_v0 }
 0x5bd   : > { %12389 = vmatprep.subr.mxu1 %v13283_v0 }
 0x5bf   : > { %12357 = vmatmul.mubr.f32.vlgmr.msra.gmra.mrb[20].mxu0 %v4478_v44 }
 0x5c0   : > { %12360 = vmatpush3.msra.mxu0 %v13701_v22  ;;  %12361 = vmatprep.mubr.msk.f32.mxu0 %vm13284_vm1, %v13283_v0 }
 0x5c1   : > { %12364 = vmatprep.subr.mxu0 %v13283_v0 }
 0x5c3   : > { %12387 = vmatmul.mubr.f32.vlgmr.msra.gmra.mrb[20].mxu1 %v4927_v51 }
 0x5c4   : > { %12390 = vmatpush3.msra.mxu1 %v13708_v23  ;;  %12391 = vmatprep.mubr.msk.f32.mxu1 %vm13284_vm1, %v13283_v0 }
 0x5c5   : > { %12394 = vmatprep.subr.mxu1 %v13283_v0 }
 0x5c7   : > { %12362 = vmatmul.mubr.f32.vlgmr.msra.gmra.mrb[20].mxu0 %v4479_v48 }
 0x5c8   : > { %12365 = vmatpush3.msra.mxu0 %v4490_v40  ;;  %12366 = vmatprep.mubr.msk.f32.mxu0 %vm13284_vm1, %v13283_v0 }
 0x5c9   : > { %12369 = vmatprep.subr.mxu0 %v13283_v0 }
 0x5cb   : > { %12392 = vmatmul.mubr.f32.vlgmr.msra.gmra.mrb[20].mxu1 %v4928_v46 }
 0x5cc   : > { %12395 = vmatpush3.msra.mxu1 %v4939_v49  ;;  %12396 = vmatprep.mubr.msk.f32.mxu1 %vm13284_vm1, %v13283_v0 }
 0x5cd   : > { %12399 = vmatprep.subr.mxu1 %v13283_v0 }
 0x5cf   : > { %12367 = vmatmul.mubr.f32.vlgmr.msra.gmra.mrb[20].mxu0 %v4477_v39 }
 0x5d0   : > { %12370 = vmatpush3.msra.mxu0 %v13701_v22  ;;  %12371 = vmatprep.mubr.msk.f32.mxu0 %vm13284_vm1, %v13283_v0 }
 0x5d1   : > { %12404 = vmatprep.subr.mxu0 %v13283_v0 }
 0x5d3   : > { %12397 = vmatmul.mubr.f32.vlgmr.msra.gmra.mrb[20].mxu1 %v4926_v47 }
 0x5d4   : > { %12400 = vmatpush3.msra.mxu1 %v13708_v23  ;;  %12401 = vmatprep.mubr.msk.f32.mxu1 %vm13284_vm1, %v13283_v0 }
 0x5d5   : > { %12434 = vmatprep.subr.mxu1 %v13283_v0 }
 0x5d7   : > { %12372 = vmatmul.mubr.f32.vlgmr.msra.gmra.mrb[20].mxu0 %v4477_v39 }
 0x5d8   : > { %12405 = vmatpush3.msra.mxu0 %v13763_v59  ;;  %12406 = vmatprep.mubr.msk.f32.mxu0 %vm13284_vm1, %v13283_v0 }
 0x5d9   : > { %12409 = vmatprep.subr.mxu0 %v13283_v0 }
 0x5db   : > { %12402 = vmatmul.mubr.f32.vlgmr.msra.gmra.mrb[20].mxu1 %v4926_v47 }
 0x5dc   : > { %12435 = vmatpush3.msra.mxu1 %v13770_v60  ;;  %12436 = vmatprep.mubr.msk.f32.mxu1 %vm13284_vm1, %v13283_v0 }
 0x5dd   : > { %12439 = vmatprep.subr.mxu1 %v13283_v0 }
 0x6aa   : > { %v13778_v37 = vpop.f32.mrb[20].mxu0 }
 0x6ab   : > { %v5307_v62 = vsel %vm1668_vm4, %v13778_v37, 0  ;;  %v12373_v63 = vpop.f32.mrb[21].mxu0  ;;  %v13823_v21 = vand.u32 4294901760, %v13778_v37 }
 0x6ac   : > { %v5375_v1 = vand.u32 4294901760, %v5307_v62 }
 0x6ad   : > { %v6293_v27 = vsub.f32 %v13778_v37, %v13823_v21 }
 0x6ae   : > { %v5376_v4 = vsub.f32 %v5307_v62, %v5375_v1  ;;  %v13784_v5 = vpop.f32.mrb[20].mxu1 }
 0x6af   : > { %v5756_v6 = vsel %vm1668_vm4, %v13784_v5, 0  ;;  %v12403_v7 = vpop.f32.mrb[21].mxu1  ;;  %v13830_v22 = vand.u32 4294901760, %v13784_v5  ;;  %v6294_v40 = vand.u32 4294901760, %v6293_v27 }
 0x6b0   : > { %v5377_v8 = vand.u32 4294901760, %v5376_v4  ;;  %v5824_v9 = vand.u32 4294901760, %v5756_v6 }
 0x6b1   : > { %v6742_v30 = vsub.f32 %v13784_v5, %v13830_v22  ;;  %v6295_v50 = vsub.f32 %v6293_v27, %v6294_v40 }
 0x6b2   : > { %v5825_v12 = vsub.f32 %v5756_v6, %v5824_v9  ;;  %v5378_v13 = vsub.f32 %v5376_v4, %v5377_v8 }
 0x6b3   : > { %v6743_v49 = vand.u32 4294901760, %v6742_v30  ;;  %v6296_v46 = vand.u32 4294901760, %v6295_v50 }
 0x6b4   : > { %v5826_v14 = vand.u32 4294901760, %v5825_v12  ;;  %v5379_v15 = vand.u32 4294901760, %v5378_v13 }
 0x6b5   : > { %v6744_v54 = vsub.f32 %v6742_v30, %v6743_v49 }
 0x6b6   : > { %12407 = vmatmul.mubr.f32.vlgmr.msra.gmra.mrb[22].mxu0 %v5379_v15  ;;  %v5827_v18 = vsub.f32 %v5825_v12, %v5826_v14 }
 0x6b7   : > { %12410 = vmatpush3.msra.mxu0 %v5390_v16  ;;  %12411 = vmatprep.mubr.msk.f32.mxu0 %vm13284_vm1, %v13283_v0  ;;  %v6745_v57 = vand.u32 4294901760, %v6744_v54 }
 0x6b8   : > { %v5828_v19 = vand.u32 4294901760, %v5827_v18  ;;  %12414 = vmatprep.subr.mxu0 %v13283_v0 }
 0x6ba   : > { %12437 = vmatmul.mubr.f32.vlgmr.msra.gmra.mrb[22].mxu1 %v5828_v19 }
 0x6bb   : > { %12440 = vmatpush3.msra.mxu1 %v5839_v20  ;;  %12441 = vmatprep.mubr.msk.f32.mxu1 %vm13284_vm1, %v13283_v0 }
 0x6bc   : > { %12444 = vmatprep.subr.mxu1 %v13283_v0 }
 0x6be   : > { %12412 = vmatmul.mubr.f32.vlgmr.msra.gmra.mrb[22].mxu0 %v5375_v1 }
 0x6bf   : > { %12415 = vmatpush3.msra.mxu0 %v5387_v61  ;;  %12416 = vmatprep.mubr.msk.f32.mxu0 %vm13284_vm1, %v13283_v0 }
 0x6c0   : > { %12419 = vmatprep.subr.mxu0 %v13283_v0 }
 0x6c2   : > { %12442 = vmatmul.mubr.f32.vlgmr.msra.gmra.mrb[22].mxu1 %v5824_v9 }
 0x6c3   : > { %12445 = vmatpush3.msra.mxu1 %v5836_v2  ;;  %12446 = vmatprep.mubr.msk.f32.mxu1 %vm13284_vm1, %v13283_v0 }
 0x6c4   : > { %12449 = vmatprep.subr.mxu1 %v13283_v0 }
 0x6c6   : > { %12417 = vmatmul.mubr.f32.vlgmr.msra.gmra.mrb[22].mxu0 %v5376_v4 }
 0x6c7   : > { %12420 = vmatpush3.msra.mxu0 %v13763_v59  ;;  %12421 = vmatprep.mubr.msk.f32.mxu0 %vm13284_vm1, %v13283_v0 }
 0x6c8   : > { %12424 = vmatprep.subr.mxu0 %v13283_v0 }
 0x6ca   : > { %12447 = vmatmul.mubr.f32.vlgmr.msra.gmra.mrb[22].mxu1 %v5825_v12 }
 0x6cb   : > { %12450 = vmatpush3.msra.mxu1 %v13770_v60  ;;  %12451 = vmatprep.mubr.msk.f32.mxu1 %vm13284_vm1, %v13283_v0 }
 0x6cc   : > { %12454 = vmatprep.subr.mxu1 %v13283_v0 }
 0x6ce   : > { %12422 = vmatmul.mubr.f32.vlgmr.msra.gmra.mrb[22].mxu0 %v5377_v8 }
 0x6cf   : > { %12425 = vmatpush3.msra.mxu0 %v5388_v3  ;;  %12426 = vmatprep.mubr.msk.f32.mxu0 %vm13284_vm1, %v13283_v0 }
 0x6d0   : > { %12429 = vmatprep.subr.mxu0 %v13283_v0 }
 0x6d2   : > { %12452 = vmatmul.mubr.f32.vlgmr.msra.gmra.mrb[22].mxu1 %v5826_v14 }
 0x6d3   : > { %12455 = vmatpush3.msra.mxu1 %v5837_v11  ;;  %12456 = vmatprep.mubr.msk.f32.mxu1 %vm13284_vm1, %v13283_v0 }
 0x6d4   : > { %12459 = vmatprep.subr.mxu1 %v13283_v0 }
 0x6d6   : > { %12427 = vmatmul.mubr.f32.vlgmr.msra.gmra.mrb[22].mxu0 %v5375_v1 }
 0x6d7   : > { %12430 = vmatpush3.msra.mxu0 %v13763_v59  ;;  %12431 = vmatprep.mubr.msk.f32.mxu0 %vm13284_vm1, %v13283_v0 }
 0x6d8   : > { %12464 = vmatprep.subr.mxu0 %v13283_v0 }
 0x6da   : > { %12457 = vmatmul.mubr.f32.vlgmr.msra.gmra.mrb[22].mxu1 %v5824_v9 }
 0x6db   : > { %12460 = vmatpush3.msra.mxu1 %v13770_v60  ;;  %12461 = vmatprep.mubr.msk.f32.mxu1 %vm13284_vm1, %v13283_v0 }
 0x6dc   : > { %12494 = vmatprep.subr.mxu1 %v13283_v0 }
 0x6de   : > { %12432 = vmatmul.mubr.f32.vlgmr.msra.gmra.mrb[22].mxu0 %v5375_v1 }
 0x6df   : > { %12465 = vmatpush3.msra.mxu0 %v13823_v21  ;;  %12466 = vmatprep.mubr.msk.f32.mxu0 %vm13284_vm1, %v13283_v0 }
 0x6e0   : > { %12469 = vmatprep.subr.mxu0 %v13283_v0 }
 0x6e2   : > { %12462 = vmatmul.mubr.f32.vlgmr.msra.gmra.mrb[22].mxu1 %v5824_v9 }
 0x6e3   : > { %12495 = vmatpush3.msra.mxu1 %v13830_v22  ;;  %12496 = vmatprep.mubr.msk.f32.mxu1 %vm13284_vm1, %v13283_v0 }
 0x6e4   : > { %12499 = vmatprep.subr.mxu1 %v13283_v0 }
 0x7b1   : > { %v5751_v23 = vpop.f32.mrb[22].mxu0 }
 0x7b2   : > { %v6204_v24 = vsub.f32 %v13584_v29, %v5751_v23  ;;  %v12433_v26 = vpop.f32.mrb[23].mxu0 }
 0x7b4   : > { %v13840_v28 = vmul.f32 %v6206_v25, %v6204_v24  ;;  %v6210_v31 = vmul.f32 0.5, %v6204_v24 }
 0x7b5   : > { %v6200_v32 = vpop.f32.mrb[22].mxu1 }
 0x7b6   : > { %v6213_v33 = vsel %vm1668_vm4, %v6210_v31, 0  ;;  %v6205_v34 = vsub.f32 %v13584_v29, %v6200_v32  ;;  %v12463_v38 = vpop.f32.mrb[23].mxu1  ;;  %v13885_v58 = vand.u32 4294901760, %v13840_v28  ;;  %v8010_v24 = vmul.f32 0.5, %v13840_v28 }
 0x7b7   : > { %v6281_v39 = vand.u32 4294901760, %v6213_v33 }
 0x7b8   : > { %v13847_v35 = vmul.f32 %v6207_v36, %v6205_v34  ;;  %v6211_v43 = vmul.f32 0.5, %v6205_v34  ;;  %v7191_v60 = vsub.f32 %v13840_v28, %v13885_v58 }
 0x7b9   : > { %v6282_v44 = vsub.f32 %v6213_v33, %v6281_v39 }
 0x7ba   : > { %v6662_v45 = vsel %vm1668_vm4, %v6211_v43, 0  ;;  %v13892_v59 = vand.u32 4294901760, %v13847_v35  ;;  %v7192_v2 = vand.u32 4294901760, %v7191_v60  ;;  %v8011_v36 = vmul.f32 0.5, %v13847_v35 }
 0x7bb   : > { %v6730_v47 = vand.u32 4294901760, %v6662_v45  ;;  %v6283_v48 = vand.u32 4294901760, %v6282_v44 }
 0x7bc   : > { %v7640_v1 = vsub.f32 %v13847_v35, %v13892_v59  ;;  %v7193_v9 = vsub.f32 %v7191_v60, %v7192_v2 }
 0x7bd   : > { %v6731_v51 = vsub.f32 %v6662_v45, %v6730_v47  ;;  %v6284_v52 = vsub.f32 %v6282_v44, %v6283_v48 }
 0x7be   : > { %v7641_v10 = vand.u32 4294901760, %v7640_v1  ;;  %v7194_v15 = vand.u32 4294901760, %v7193_v9 }
 0x7bf   : > { %v6285_v53 = vand.u32 4294901760, %v6284_v52  ;;  %v6732_v42 = vand.u32 4294901760, %v6731_v51 }
 0x7c0   : > { %v7642_v16 = vsub.f32 %v7640_v1, %v7641_v10 }
 0x7c1   : > { %12467 = vmatmul.mubr.f32.vlgmr.msra.gmra.mrb[24].mxu0 %v6285_v53  ;;  %v6733_v55 = vsub.f32 %v6731_v51, %v6732_v42 }
 0x7c2   : > { %12470 = vmatpush3.msra.mxu0 %v6296_v46  ;;  %12471 = vmatprep.mubr.msk.f32.mxu0 %vm13284_vm1, %v13283_v0  ;;  %v7643_v19 = vand.u32 4294901760, %v7642_v16 }
 0x7c3   : > { %v6734_v56 = vand.u32 4294901760, %v6733_v55  ;;  %12474 = vmatprep.subr.mxu0 %v13283_v0 }
 0x7c5   : > { %12497 = vmatmul.mubr.f32.vlgmr.msra.gmra.mrb[24].mxu1 %v6734_v56 }
 0x7c6   : > { %12500 = vmatpush3.msra.mxu1 %v6745_v57  ;;  %12501 = vmatprep.mubr.msk.f32.mxu1 %vm13284_vm1, %v13283_v0 }
 0x7c7   : > { %12504 = vmatprep.subr.mxu1 %v13283_v0 }
 0x7c9   : > { %12472 = vmatmul.mubr.f32.vlgmr.msra.gmra.mrb[24].mxu0 %v6281_v39 }
 0x7ca   : > { %12475 = vmatpush3.msra.mxu0 %v6293_v27  ;;  %12476 = vmatprep.mubr.msk.f32.mxu0 %vm13284_vm1, %v13283_v0 }
 0x7cb   : > { %12479 = vmatprep.subr.mxu0 %v13283_v0 }
 0x7cd   : > { %12502 = vmatmul.mubr.f32.vlgmr.msra.gmra.mrb[24].mxu1 %v6730_v47 }
 0x7ce   : > { %12505 = vmatpush3.msra.mxu1 %v6742_v30  ;;  %12506 = vmatprep.mubr.msk.f32.mxu1 %vm13284_vm1, %v13283_v0 }
 0x7cf   : > { %12509 = vmatprep.subr.mxu1 %v13283_v0 }
 0x7d1   : > { %12477 = vmatmul.mubr.f32.vlgmr.msra.gmra.mrb[24].mxu0 %v6282_v44 }
 0x7d2   : > { %12480 = vmatpush3.msra.mxu0 %v13823_v21  ;;  %12481 = vmatprep.mubr.msk.f32.mxu0 %vm13284_vm1, %v13283_v0 }
 0x7d3   : > { %12484 = vmatprep.subr.mxu0 %v13283_v0 }
 0x7d5   : > { %12507 = vmatmul.mubr.f32.vlgmr.msra.gmra.mrb[24].mxu1 %v6731_v51 }
 0x7d6   : > { %12510 = vmatpush3.msra.mxu1 %v13830_v22  ;;  %12511 = vmatprep.mubr.msk.f32.mxu1 %vm13284_vm1, %v13283_v0 }
 0x7d7   : > { %12514 = vmatprep.subr.mxu1 %v13283_v0 }
 0x7d9   : > { %12482 = vmatmul.mubr.f32.vlgmr.msra.gmra.mrb[24].mxu0 %v6283_v48 }
 0x7da   : > { %12485 = vmatpush3.msra.mxu0 %v6294_v40  ;;  %12486 = vmatprep.mubr.msk.f32.mxu0 %vm13284_vm1, %v13283_v0 }
 0x7db   : > { %12489 = vmatprep.subr.mxu0 %v13283_v0 }
 0x7dd   : > { %12512 = vmatmul.mubr.f32.vlgmr.msra.gmra.mrb[24].mxu1 %v6732_v42 }
 0x7de   : > { %12515 = vmatpush3.msra.mxu1 %v6743_v49  ;;  %12516 = vmatprep.mubr.msk.f32.mxu1 %vm13284_vm1, %v13283_v0 }
 0x7df   : > { %12519 = vmatprep.subr.mxu1 %v13283_v0 }
 0x7e1   : > { %12487 = vmatmul.mubr.f32.vlgmr.msra.gmra.mrb[24].mxu0 %v6281_v39 }
 0x7e2   : > { %12490 = vmatpush3.msra.mxu0 %v13823_v21  ;;  %12491 = vmatprep.mubr.msk.f32.mxu0 %vm13284_vm1, %v13283_v0 }
 0x7e3   : > { %12524 = vmatprep.subr.mxu0 %v13283_v0 }
 0x7e5   : > { %12517 = vmatmul.mubr.f32.vlgmr.msra.gmra.mrb[24].mxu1 %v6730_v47 }
 0x7e6   : > { %12520 = vmatpush3.msra.mxu1 %v13830_v22  ;;  %12521 = vmatprep.mubr.msk.f32.mxu1 %vm13284_vm1, %v13283_v0 }
 0x7e7   : > { %12554 = vmatprep.subr.mxu1 %v13283_v0 }
 0x7e9   : > { %12492 = vmatmul.mubr.f32.vlgmr.msra.gmra.mrb[24].mxu0 %v6281_v39 }
 0x7ea   : > { %12525 = vmatpush3.msra.mxu0 %v13885_v58  ;;  %12526 = vmatprep.mubr.msk.f32.mxu0 %vm13284_vm1, %v13283_v0 }
 0x7eb   : > { %12529 = vmatprep.subr.mxu0 %v13283_v0 }
 0x7ed   : > { %12522 = vmatmul.mubr.f32.vlgmr.msra.gmra.mrb[24].mxu1 %v6730_v47 }
 0x7ee   : > { %12555 = vmatpush3.msra.mxu1 %v13892_v59  ;;  %12556 = vmatprep.mubr.msk.f32.mxu1 %vm13284_vm1, %v13283_v0 }
 0x7ef   : > { %12559 = vmatprep.subr.mxu1 %v13283_v0 }
 0x8bc   : > { %v13900_v61 = vpop.f32.mrb[24].mxu0 }
 0x8bd   : > { %v7111_v37 = vsel %vm1668_vm4, %v13900_v61, 0  ;;  %v12493_v62 = vpop.f32.mrb[25].mxu0  ;;  %v13945_v20 = vand.u32 4294901760, %v13900_v61 }
 0x8be   : > { %v7179_v63 = vand.u32 4294901760, %v7111_v37 }
 0x8bf   : > { %v8097_v26 = vsub.f32 %v13900_v61, %v13945_v20 }
 0x8c0   : > { %v7180_v3 = vsub.f32 %v7111_v37, %v7179_v63  ;;  %v13906_v4 = vpop.f32.mrb[24].mxu1 }
 0x8c1   : > { %v7560_v5 = vsel %vm1668_vm4, %v13906_v4, 0  ;;  %v12523_v6 = vpop.f32.mrb[25].mxu1  ;;  %v13952_v21 = vand.u32 4294901760, %v13906_v4  ;;  %v8098_v40 = vand.u32 4294901760, %v8097_v26 }
 0x8c2   : > { %v7181_v7 = vand.u32 4294901760, %v7180_v3  ;;  %v7628_v8 = vand.u32 4294901760, %v7560_v5 }
 0x8c3   : > { %v8546_v28 = vsub.f32 %v13906_v4, %v13952_v21  ;;  %v8099_v50 = vsub.f32 %v8097_v26, %v8098_v40 }
 0x8c4   : > { %v7629_v11 = vsub.f32 %v7560_v5, %v7628_v8  ;;  %v7182_v12 = vsub.f32 %v7180_v3, %v7181_v7 }
 0x8c5   : > { %v8547_v49 = vand.u32 4294901760, %v8546_v28  ;;  %v8100_v42 = vand.u32 4294901760, %v8099_v50 }
 0x8c6   : > { %v7630_v13 = vand.u32 4294901760, %v7629_v11  ;;  %v7183_v14 = vand.u32 4294901760, %v7182_v12 }
 0x8c7   : > { %v8548_v46 = vsub.f32 %v8546_v28, %v8547_v49 }
 0x8c8   : > { %12527 = vmatmul.mubr.f32.vlgmr.msra.gmra.mrb[26].mxu0 %v7183_v14  ;;  %v7631_v17 = vsub.f32 %v7629_v11, %v7630_v13 }
 0x8c9   : > { %12530 = vmatpush3.msra.mxu0 %v7194_v15  ;;  %12531 = vmatprep.mubr.msk.f32.mxu0 %vm13284_vm1, %v13283_v0  ;;  %v8549_v56 = vand.u32 4294901760, %v8548_v46 }
 0x8ca   : > { %v7632_v18 = vand.u32 4294901760, %v7631_v17  ;;  %12534 = vmatprep.subr.mxu0 %v13283_v0 }
 0x8cc   : > { %12557 = vmatmul.mubr.f32.vlgmr.msra.gmra.mrb[26].mxu1 %v7632_v18 }
 0x8cd   : > { %12560 = vmatpush3.msra.mxu1 %v7643_v19  ;;  %12561 = vmatprep.mubr.msk.f32.mxu1 %vm13284_vm1, %v13283_v0 }
 0x8ce   : > { %12564 = vmatprep.subr.mxu1 %v13283_v0 }
 0x8d0   : > { %12532 = vmatmul.mubr.f32.vlgmr.msra.gmra.mrb[26].mxu0 %v7179_v63 }
 0x8d1   : > { %12535 = vmatpush3.msra.mxu0 %v7191_v60  ;;  %12536 = vmatprep.mubr.msk.f32.mxu0 %vm13284_vm1, %v13283_v0 }
 0x8d2   : > { %12539 = vmatprep.subr.mxu0 %v13283_v0 }
 0x8d4   : > { %12562 = vmatmul.mubr.f32.vlgmr.msra.gmra.mrb[26].mxu1 %v7628_v8 }
 0x8d5   : > { %12565 = vmatpush3.msra.mxu1 %v7640_v1  ;;  %12566 = vmatprep.mubr.msk.f32.mxu1 %vm13284_vm1, %v13283_v0 }
 0x8d6   : > { %12569 = vmatprep.subr.mxu1 %v13283_v0 }
 0x8d8   : > { %12537 = vmatmul.mubr.f32.vlgmr.msra.gmra.mrb[26].mxu0 %v7180_v3 }
 0x8d9   : > { %12540 = vmatpush3.msra.mxu0 %v13885_v58  ;;  %12541 = vmatprep.mubr.msk.f32.mxu0 %vm13284_vm1, %v13283_v0 }
 0x8da   : > { %12544 = vmatprep.subr.mxu0 %v13283_v0 }
 0x8dc   : > { %12567 = vmatmul.mubr.f32.vlgmr.msra.gmra.mrb[26].mxu1 %v7629_v11 }
 0x8dd   : > { %12570 = vmatpush3.msra.mxu1 %v13892_v59  ;;  %12571 = vmatprep.mubr.msk.f32.mxu1 %vm13284_vm1, %v13283_v0 }
 0x8de   : > { %12574 = vmatprep.subr.mxu1 %v13283_v0 }
 0x8e0   : > { %12542 = vmatmul.mubr.f32.vlgmr.msra.gmra.mrb[26].mxu0 %v7181_v7 }
 0x8e1   : > { %12545 = vmatpush3.msra.mxu0 %v7192_v2  ;;  %12546 = vmatprep.mubr.msk.f32.mxu0 %vm13284_vm1, %v13283_v0 }
 0x8e2   : > { %12549 = vmatprep.subr.mxu0 %v13283_v0 }
 0x8e4   : > { %12572 = vmatmul.mubr.f32.vlgmr.msra.gmra.mrb[26].mxu1 %v7630_v13 }
 0x8e5   : > { %12575 = vmatpush3.msra.mxu1 %v7641_v10  ;;  %12576 = vmatprep.mubr.msk.f32.mxu1 %vm13284_vm1, %v13283_v0 }
 0x8e6   : > { %12579 = vmatprep.subr.mxu1 %v13283_v0 }
 0x8e8   : > { %12547 = vmatmul.mubr.f32.vlgmr.msra.gmra.mrb[26].mxu0 %v7179_v63 }
 0x8e9   : > { %12550 = vmatpush3.msra.mxu0 %v13885_v58  ;;  %12551 = vmatprep.mubr.msk.f32.mxu0 %vm13284_vm1, %v13283_v0 }
 0x8ea   : > { %12584 = vmatprep.subr.mxu0 %v13283_v0 }
 0x8ec   : > { %12577 = vmatmul.mubr.f32.vlgmr.msra.gmra.mrb[26].mxu1 %v7628_v8 }
 0x8ed   : > { %12580 = vmatpush3.msra.mxu1 %v13892_v59  ;;  %12581 = vmatprep.mubr.msk.f32.mxu1 %vm13284_vm1, %v13283_v0 }
 0x8ee   : > { %12614 = vmatprep.subr.mxu1 %v13283_v0 }
 0x8f0   : > { %12552 = vmatmul.mubr.f32.vlgmr.msra.gmra.mrb[26].mxu0 %v7179_v63 }
 0x8f1   : > { %12585 = vmatpush3.msra.mxu0 %v13945_v20  ;;  %12586 = vmatprep.mubr.msk.f32.mxu0 %vm13284_vm1, %v13283_v0 }
 0x8f2   : > { %12589 = vmatprep.subr.mxu0 %v13283_v0 }
 0x8f4   : > { %12582 = vmatmul.mubr.f32.vlgmr.msra.gmra.mrb[26].mxu1 %v7628_v8 }
 0x8f5   : > { %12615 = vmatpush3.msra.mxu1 %v13952_v21  ;;  %12616 = vmatprep.mubr.msk.f32.mxu1 %vm13284_vm1, %v13283_v0 }
 0x8f6   : > { %12619 = vmatprep.subr.mxu1 %v13283_v0 }
 0x9c3   : > { %v7555_v22 = vpop.f32.mrb[26].mxu0 }
 0x9c4   : > { %v8008_v23 = vsub.f32 %v13584_v29, %v7555_v22  ;;  %v12553_v25 = vpop.f32.mrb[27].mxu0 }
 0x9c6   : > { %v13962_v27 = vmul.f32 %v8010_v24, %v8008_v23  ;;  %v8014_v31 = vmul.f32 0.5, %v8008_v23 }
 0x9c7   : > { %v8004_v32 = vpop.f32.mrb[26].mxu1 }
 0x9c8   : > { %v8017_v33 = vsel %vm1668_vm4, %v8014_v31, 0  ;;  %v8009_v34 = vsub.f32 %v13584_v29, %v8004_v32  ;;  %v12583_v38 = vpop.f32.mrb[27].mxu1  ;;  %v14007_v57 = vand.u32 4294901760, %v13962_v27  ;;  %v9814_v23 = vmul.f32 0.5, %v13962_v27 }
 0x9c9   : > { %v8085_v39 = vand.u32 4294901760, %v8017_v33 }
 0x9ca   : > { %v13969_v30 = vmul.f32 %v8011_v36, %v8009_v34  ;;  %v8015_v43 = vmul.f32 0.5, %v8009_v34  ;;  %v8995_v59 = vsub.f32 %v13962_v27, %v14007_v57 }
 0x9cb   : > { %v8086_v44 = vsub.f32 %v8017_v33, %v8085_v39 }
 0x9cc   : > { %v8466_v45 = vsel %vm1668_vm4, %v8015_v43, 0  ;;  %v14014_v58 = vand.u32 4294901760, %v13969_v30  ;;  %v8996_v1 = vand.u32 4294901760, %v8995_v59  ;;  %v9815_v36 = vmul.f32 0.5, %v13969_v30 }
 0x9cd   : > { %v8534_v47 = vand.u32 4294901760, %v8466_v45  ;;  %v8087_v48 = vand.u32 4294901760, %v8086_v44 }
 0x9ce   : > { %v9444_v63 = vsub.f32 %v13969_v30, %v14014_v58  ;;  %v8997_v8 = vsub.f32 %v8995_v59, %v8996_v1 }
 0x9cf   : > { %v8535_v51 = vsub.f32 %v8466_v45, %v8534_v47  ;;  %v8088_v52 = vsub.f32 %v8086_v44, %v8087_v48 }
 0x9d0   : > { %v9445_v9 = vand.u32 4294901760, %v9444_v63  ;;  %v8998_v14 = vand.u32 4294901760, %v8997_v8 }
 0x9d1   : > { %v8089_v53 = vand.u32 4294901760, %v8088_v52  ;;  %v8536_v35 = vand.u32 4294901760, %v8535_v51 }
 0x9d2   : > { %v9446_v15 = vsub.f32 %v9444_v63, %v9445_v9 }
 0x9d3   : > { %12587 = vmatmul.mubr.f32.vlgmr.msra.gmra.mrb[28].mxu0 %v8089_v53  ;;  %v8537_v54 = vsub.f32 %v8535_v51, %v8536_v35 }
 0x9d4   : > { %12590 = vmatpush3.msra.mxu0 %v8100_v42  ;;  %12591 = vmatprep.mubr.msk.f32.mxu0 %vm13284_vm1, %v13283_v0  ;;  %v9447_v18 = vand.u32 4294901760, %v9446_v15 }
 0x9d5   : > { %v8538_v55 = vand.u32 4294901760, %v8537_v54  ;;  %12594 = vmatprep.subr.mxu0 %v13283_v0 }
 0x9d7   : > { %12617 = vmatmul.mubr.f32.vlgmr.msra.gmra.mrb[28].mxu1 %v8538_v55 }
 0x9d8   : > { %12620 = vmatpush3.msra.mxu1 %v8549_v56  ;;  %12621 = vmatprep.mubr.msk.f32.mxu1 %vm13284_vm1, %v13283_v0 }
 0x9d9   : > { %12624 = vmatprep.subr.mxu1 %v13283_v0 }
 0x9db   : > { %12592 = vmatmul.mubr.f32.vlgmr.msra.gmra.mrb[28].mxu0 %v8085_v39 }
 0x9dc   : > { %12595 = vmatpush3.msra.mxu0 %v8097_v26  ;;  %12596 = vmatprep.mubr.msk.f32.mxu0 %vm13284_vm1, %v13283_v0 }
 0x9dd   : > { %12599 = vmatprep.subr.mxu0 %v13283_v0 }
 0x9df   : > { %12622 = vmatmul.mubr.f32.vlgmr.msra.gmra.mrb[28].mxu1 %v8534_v47 }
 0x9e0   : > { %12625 = vmatpush3.msra.mxu1 %v8546_v28  ;;  %12626 = vmatprep.mubr.msk.f32.mxu1 %vm13284_vm1, %v13283_v0 }
 0x9e1   : > { %12629 = vmatprep.subr.mxu1 %v13283_v0 }
 0x9e3   : > { %12597 = vmatmul.mubr.f32.vlgmr.msra.gmra.mrb[28].mxu0 %v8086_v44 }
 0x9e4   : > { %12600 = vmatpush3.msra.mxu0 %v13945_v20  ;;  %12601 = vmatprep.mubr.msk.f32.mxu0 %vm13284_vm1, %v13283_v0 }
 0x9e5   : > { %12604 = vmatprep.subr.mxu0 %v13283_v0 }
 0x9e7   : > { %12627 = vmatmul.mubr.f32.vlgmr.msra.gmra.mrb[28].mxu1 %v8535_v51 }
 0x9e8   : > { %12630 = vmatpush3.msra.mxu1 %v13952_v21  ;;  %12631 = vmatprep.mubr.msk.f32.mxu1 %vm13284_vm1, %v13283_v0 }
 0x9e9   : > { %12634 = vmatprep.subr.mxu1 %v13283_v0 }
 0x9eb   : > { %12602 = vmatmul.mubr.f32.vlgmr.msra.gmra.mrb[28].mxu0 %v8087_v48 }
 0x9ec   : > { %12605 = vmatpush3.msra.mxu0 %v8098_v40  ;;  %12606 = vmatprep.mubr.msk.f32.mxu0 %vm13284_vm1, %v13283_v0 }
 0x9ed   : > { %12609 = vmatprep.subr.mxu0 %v13283_v0 }
 0x9ef   : > { %12632 = vmatmul.mubr.f32.vlgmr.msra.gmra.mrb[28].mxu1 %v8536_v35 }
 0x9f0   : > { %12635 = vmatpush3.msra.mxu1 %v8547_v49  ;;  %12636 = vmatprep.mubr.msk.f32.mxu1 %vm13284_vm1, %v13283_v0 }
 0x9f1   : > { %12639 = vmatprep.subr.mxu1 %v13283_v0 }
 0x9f3   : > { %12607 = vmatmul.mubr.f32.vlgmr.msra.gmra.mrb[28].mxu0 %v8085_v39 }
 0x9f4   : > { %12610 = vmatpush3.msra.mxu0 %v13945_v20  ;;  %12611 = vmatprep.mubr.msk.f32.mxu0 %vm13284_vm1, %v13283_v0 }
 0x9f5   : > { %12644 = vmatprep.subr.mxu0 %v13283_v0 }
 0x9f7   : > { %12637 = vmatmul.mubr.f32.vlgmr.msra.gmra.mrb[28].mxu1 %v8534_v47 }
 0x9f8   : > { %12640 = vmatpush3.msra.mxu1 %v13952_v21  ;;  %12641 = vmatprep.mubr.msk.f32.mxu1 %vm13284_vm1, %v13283_v0 }
 0x9f9   : > { %12674 = vmatprep.subr.mxu1 %v13283_v0 }
 0x9fb   : > { %12612 = vmatmul.mubr.f32.vlgmr.msra.gmra.mrb[28].mxu0 %v8085_v39 }
 0x9fc   : > { %12645 = vmatpush3.msra.mxu0 %v14007_v57  ;;  %12646 = vmatprep.mubr.msk.f32.mxu0 %vm13284_vm1, %v13283_v0 }
 0x9fd   : > { %12649 = vmatprep.subr.mxu0 %v13283_v0 }
 0x9ff   : > { %12642 = vmatmul.mubr.f32.vlgmr.msra.gmra.mrb[28].mxu1 %v8534_v47 }
 0xa00   : > { %12675 = vmatpush3.msra.mxu1 %v14014_v58  ;;  %12676 = vmatprep.mubr.msk.f32.mxu1 %vm13284_vm1, %v13283_v0 }
 0xa01   : > { %12679 = vmatprep.subr.mxu1 %v13283_v0 }
 0xace   : > { %v14022_v60 = vpop.f32.mrb[28].mxu0 }
 0xacf   : > { %v8915_v61 = vsel %vm1668_vm4, %v14022_v60, 0  ;;  %v12613_v37 = vpop.f32.mrb[29].mxu0  ;;  %v14067_v19 = vand.u32 4294901760, %v14022_v60 }
 0xad0   : > { %v8983_v62 = vand.u32 4294901760, %v8915_v61 }
 0xad1   : > { %v9901_v25 = vsub.f32 %v14022_v60, %v14067_v19 }
 0xad2   : > { %v8984_v2 = vsub.f32 %v8915_v61, %v8983_v62  ;;  %v14028_v3 = vpop.f32.mrb[28].mxu1 }
 0xad3   : > { %v9364_v4 = vsel %vm1668_vm4, %v14028_v3, 0  ;;  %v12643_v5 = vpop.f32.mrb[29].mxu1  ;;  %v14074_v20 = vand.u32 4294901760, %v14028_v3  ;;  %v9902_v40 = vand.u32 4294901760, %v9901_v25 }
 0xad4   : > { %v8985_v6 = vand.u32 4294901760, %v8984_v2  ;;  %v9432_v7 = vand.u32 4294901760, %v9364_v4 }
 0xad5   : > { %v10350_v27 = vsub.f32 %v14028_v3, %v14074_v20  ;;  %v9903_v50 = vsub.f32 %v9901_v25, %v9902_v40 }
 0xad6   : > { %v9433_v10 = vsub.f32 %v9364_v4, %v9432_v7  ;;  %v8986_v11 = vsub.f32 %v8984_v2, %v8985_v6 }
 0xad7   : > { %v10351_v49 = vand.u32 4294901760, %v10350_v27  ;;  %v9904_v35 = vand.u32 4294901760, %v9903_v50 }
 0xad8   : > { %v9434_v12 = vand.u32 4294901760, %v9433_v10  ;;  %v8987_v13 = vand.u32 4294901760, %v8986_v11 }
 0xad9   : > { %v10352_v42 = vsub.f32 %v10350_v27, %v10351_v49 }
 0xada   : > { %12647 = vmatmul.mubr.f32.vlgmr.msra.gmra.mrb[30].mxu0 %v8987_v13  ;;  %v9435_v16 = vsub.f32 %v9433_v10, %v9434_v12 }
 0xadb   : > { %12650 = vmatpush3.msra.mxu0 %v8998_v14  ;;  %12651 = vmatprep.mubr.msk.f32.mxu0 %vm13284_vm1, %v13283_v0  ;;  %v10353_v55 = vand.u32 4294901760, %v10352_v42 }
 0xadc   : > { %v9436_v17 = vand.u32 4294901760, %v9435_v16  ;;  %12654 = vmatprep.subr.mxu0 %v13283_v0 }
 0xade   : > { %12677 = vmatmul.mubr.f32.vlgmr.msra.gmra.mrb[30].mxu1 %v9436_v17 }
 0xadf   : > { %12680 = vmatpush3.msra.mxu1 %v9447_v18  ;;  %12681 = vmatprep.mubr.msk.f32.mxu1 %vm13284_vm1, %v13283_v0 }
 0xae0   : > { %12684 = vmatprep.subr.mxu1 %v13283_v0 }
 0xae2   : > { %12652 = vmatmul.mubr.f32.vlgmr.msra.gmra.mrb[30].mxu0 %v8983_v62 }
 0xae3   : > { %12655 = vmatpush3.msra.mxu0 %v8995_v59  ;;  %12656 = vmatprep.mubr.msk.f32.mxu0 %vm13284_vm1, %v13283_v0 }
 0xae4   : > { %12659 = vmatprep.subr.mxu0 %v13283_v0 }
 0xae6   : > { %12682 = vmatmul.mubr.f32.vlgmr.msra.gmra.mrb[30].mxu1 %v9432_v7 }
 0xae7   : > { %12685 = vmatpush3.msra.mxu1 %v9444_v63  ;;  %12686 = vmatprep.mubr.msk.f32.mxu1 %vm13284_vm1, %v13283_v0 }
 0xae8   : > { %12689 = vmatprep.subr.mxu1 %v13283_v0 }
 0xaea   : > { %12657 = vmatmul.mubr.f32.vlgmr.msra.gmra.mrb[30].mxu0 %v8984_v2 }
 0xaeb   : > { %12660 = vmatpush3.msra.mxu0 %v14007_v57  ;;  %12661 = vmatprep.mubr.msk.f32.mxu0 %vm13284_vm1, %v13283_v0 }
 0xaec   : > { %12664 = vmatprep.subr.mxu0 %v13283_v0 }
 0xaee   : > { %12687 = vmatmul.mubr.f32.vlgmr.msra.gmra.mrb[30].mxu1 %v9433_v10 }
 0xaef   : > { %12690 = vmatpush3.msra.mxu1 %v14014_v58  ;;  %12691 = vmatprep.mubr.msk.f32.mxu1 %vm13284_vm1, %v13283_v0 }
 0xaf0   : > { %12694 = vmatprep.subr.mxu1 %v13283_v0 }
 0xaf2   : > { %12662 = vmatmul.mubr.f32.vlgmr.msra.gmra.mrb[30].mxu0 %v8985_v6 }
 0xaf3   : > { %12665 = vmatpush3.msra.mxu0 %v8996_v1  ;;  %12666 = vmatprep.mubr.msk.f32.mxu0 %vm13284_vm1, %v13283_v0 }
 0xaf4   : > { %12669 = vmatprep.subr.mxu0 %v13283_v0 }
 0xaf6   : > { %12692 = vmatmul.mubr.f32.vlgmr.msra.gmra.mrb[30].mxu1 %v9434_v12 }
 0xaf7   : > { %12695 = vmatpush3.msra.mxu1 %v9445_v9  ;;  %12696 = vmatprep.mubr.msk.f32.mxu1 %vm13284_vm1, %v13283_v0 }
 0xaf8   : > { %12699 = vmatprep.subr.mxu1 %v13283_v0 }
 0xafa   : > { %12667 = vmatmul.mubr.f32.vlgmr.msra.gmra.mrb[30].mxu0 %v8983_v62 }
 0xafb   : > { %12670 = vmatpush3.msra.mxu0 %v14007_v57  ;;  %12671 = vmatprep.mubr.msk.f32.mxu0 %vm13284_vm1, %v13283_v0 }
 0xafc   : > { %12704 = vmatprep.subr.mxu0 %v13283_v0 }
 0xafe   : > { %12697 = vmatmul.mubr.f32.vlgmr.msra.gmra.mrb[30].mxu1 %v9432_v7 }
 0xaff   : > { %12700 = vmatpush3.msra.mxu1 %v14014_v58  ;;  %12701 = vmatprep.mubr.msk.f32.mxu1 %vm13284_vm1, %v13283_v0 }
 0xb00   : > { %12734 = vmatprep.subr.mxu1 %v13283_v0 }
 0xb02   : > { %12672 = vmatmul.mubr.f32.vlgmr.msra.gmra.mrb[30].mxu0 %v8983_v62 }
 0xb03   : > { %12705 = vmatpush3.msra.mxu0 %v14067_v19  ;;  %12706 = vmatprep.mubr.msk.f32.mxu0 %vm13284_vm1, %v13283_v0 }
 0xb04   : > { %12709 = vmatprep.subr.mxu0 %v13283_v0 }
 0xb06   : > { %12702 = vmatmul.mubr.f32.vlgmr.msra.gmra.mrb[30].mxu1 %v9432_v7 }
 0xb07   : > { %12735 = vmatpush3.msra.mxu1 %v14074_v20  ;;  %12736 = vmatprep.mubr.msk.f32.mxu1 %vm13284_vm1, %v13283_v0 }
 0xb08   : > { %12739 = vmatprep.subr.mxu1 %v13283_v0 }
 0xbd5   : > { %v9359_v21 = vpop.f32.mrb[30].mxu0 }
 0xbd6   : > { %v9812_v22 = vsub.f32 %v13584_v29, %v9359_v21  ;;  %v12673_v24 = vpop.f32.mrb[31].mxu0 }
 0xbd8   : > { %v14084_v26 = vmul.f32 %v9814_v23, %v9812_v22  ;;  %v9818_v31 = vmul.f32 0.5, %v9812_v22 }
 0xbd9   : > { %v9808_v32 = vpop.f32.mrb[30].mxu1 }
 0xbda   : > { %v9821_v33 = vsel %vm1668_vm4, %v9818_v31, 0  ;;  %v9813_v34 = vsub.f32 %v13584_v29, %v9808_v32  ;;  %v12703_v38 = vpop.f32.mrb[31].mxu1  ;;  %v14129_v56 = vand.u32 4294901760, %v14084_v26 }
 0xbdb   : > { %v9889_v39 = vand.u32 4294901760, %v9821_v33 }
 0xbdc   : > { %v14091_v28 = vmul.f32 %v9815_v36, %v9813_v34  ;;  %v9819_v43 = vmul.f32 0.5, %v9813_v34  ;;  %v10799_v58 = vsub.f32 %v14084_v26, %v14129_v56 }
 0xbdd   : > { %v9890_v44 = vsub.f32 %v9821_v33, %v9889_v39 }
 0xbde   : > { %v10270_v45 = vsel %vm1668_vm4, %v9819_v43, 0  ;;  %v14136_v57 = vand.u32 4294901760, %v14091_v28  ;;  %v10800_v63 = vand.u32 4294901760, %v10799_v58 }
 0xbdf   : > { %v10338_v47 = vand.u32 4294901760, %v10270_v45  ;;  %v9891_v48 = vand.u32 4294901760, %v9890_v44 }
 0xbe0   : > { %v11248_v62 = vsub.f32 %v14091_v28, %v14136_v57  ;;  %v10801_v7 = vsub.f32 %v10799_v58, %v10800_v63 }
 0xbe1   : > { %v10339_v51 = vsub.f32 %v10270_v45, %v10338_v47  ;;  %v9892_v52 = vsub.f32 %v9890_v44, %v9891_v48 }
 0xbe2   : > { %v11249_v8 = vand.u32 4294901760, %v11248_v62  ;;  %v10802_v13 = vand.u32 4294901760, %v10801_v7 }
 0xbe3   : > { %v9893_v53 = vand.u32 4294901760, %v9892_v52  ;;  %v10340_v30 = vand.u32 4294901760, %v10339_v51 }
 0xbe4   : > { %v11250_v14 = vsub.f32 %v11248_v62, %v11249_v8 }
 0xbe5   : > { %12707 = vmatmul.mubr.f32.vlgmr.msra.gmra.mrb[32].mxu0 %v9893_v53  ;;  %v10341_v46 = vsub.f32 %v10339_v51, %v10340_v30 }
 0xbe6   : > { %12710 = vmatpush3.msra.mxu0 %v9904_v35  ;;  %12711 = vmatprep.mubr.msk.f32.mxu0 %vm13284_vm1, %v13283_v0  ;;  %v11251_v17 = vand.u32 4294901760, %v11250_v14 }
 0xbe7   : > { %v10342_v54 = vand.u32 4294901760, %v10341_v46  ;;  %12714 = vmatprep.subr.mxu0 %v13283_v0 }
 0xbe9   : > { %12737 = vmatmul.mubr.f32.vlgmr.msra.gmra.mrb[32].mxu1 %v10342_v54 }
 0xbea   : > { %12740 = vmatpush3.msra.mxu1 %v10353_v55  ;;  %12741 = vmatprep.mubr.msk.f32.mxu1 %vm13284_vm1, %v13283_v0 }
 0xbeb   : > { %12744 = vmatprep.subr.mxu1 %v13283_v0 }
 0xbed   : > { %12712 = vmatmul.mubr.f32.vlgmr.msra.gmra.mrb[32].mxu0 %v9889_v39 }
 0xbee   : > { %12715 = vmatpush3.msra.mxu0 %v9901_v25  ;;  %12716 = vmatprep.mubr.msk.f32.mxu0 %vm13284_vm1, %v13283_v0  ;;  %v11619_v25 = vmul.f32 0.5, %v14091_v28 }
 0xbef   : > { %12719 = vmatprep.subr.mxu0 %v13283_v0 }
 0xbf1   : > { %12742 = vmatmul.mubr.f32.vlgmr.msra.gmra.mrb[32].mxu1 %v10338_v47 }
 0xbf2   : > { %12745 = vmatpush3.msra.mxu1 %v10350_v27  ;;  %12746 = vmatprep.mubr.msk.f32.mxu1 %vm13284_vm1, %v13283_v0 }
 0xbf3   : > { %12749 = vmatprep.subr.mxu1 %v13283_v0 }
 0xbf5   : > { %12717 = vmatmul.mubr.f32.vlgmr.msra.gmra.mrb[32].mxu0 %v9890_v44 }
 0xbf6   : > { %12720 = vmatpush3.msra.mxu0 %v14067_v19  ;;  %12721 = vmatprep.mubr.msk.f32.mxu0 %vm13284_vm1, %v13283_v0 }
 0xbf7   : > { %12724 = vmatprep.subr.mxu0 %v13283_v0 }
 0xbf9   : > { %12747 = vmatmul.mubr.f32.vlgmr.msra.gmra.mrb[32].mxu1 %v10339_v51 }
 0xbfa   : > { %12750 = vmatpush3.msra.mxu1 %v14074_v20  ;;  %12751 = vmatprep.mubr.msk.f32.mxu1 %vm13284_vm1, %v13283_v0 }
 0xbfb   : > { %12754 = vmatprep.subr.mxu1 %v13283_v0 }
 0xbfd   : > { %12722 = vmatmul.mubr.f32.vlgmr.msra.gmra.mrb[32].mxu0 %v9891_v48 }
 0xbfe   : > { %12725 = vmatpush3.msra.mxu0 %v9902_v40  ;;  %12726 = vmatprep.mubr.msk.f32.mxu0 %vm13284_vm1, %v13283_v0 }
 0xbff   : > { %12729 = vmatprep.subr.mxu0 %v13283_v0 }
 0xc01   : > { %12752 = vmatmul.mubr.f32.vlgmr.msra.gmra.mrb[32].mxu1 %v10340_v30 }
 0xc02   : > { %12755 = vmatpush3.msra.mxu1 %v10351_v49  ;;  %12756 = vmatprep.mubr.msk.f32.mxu1 %vm13284_vm1, %v13283_v0 }
 0xc03   : > { %12759 = vmatprep.subr.mxu1 %v13283_v0 }
 0xc05   : > { %12727 = vmatmul.mubr.f32.vlgmr.msra.gmra.mrb[32].mxu0 %v9889_v39 }
 0xc06   : > { %12730 = vmatpush3.msra.mxu0 %v14067_v19  ;;  %12731 = vmatprep.mubr.msk.f32.mxu0 %vm13284_vm1, %v13283_v0 }
 0xc07   : > { %12764 = vmatprep.subr.mxu0 %v13283_v0 }
 0xc09   : > { %12757 = vmatmul.mubr.f32.vlgmr.msra.gmra.mrb[32].mxu1 %v10338_v47 }
 0xc0a   : > { %12760 = vmatpush3.msra.mxu1 %v14074_v20  ;;  %12761 = vmatprep.mubr.msk.f32.mxu1 %vm13284_vm1, %v13283_v0  ;;  %v11618_v20 = vmul.f32 0.5, %v14084_v26 }
 0xc0b   : > { %12794 = vmatprep.subr.mxu1 %v13283_v0 }
 0xc0d   : > { %12732 = vmatmul.mubr.f32.vlgmr.msra.gmra.mrb[32].mxu0 %v9889_v39 }
 0xc0e   : > { %12765 = vmatpush3.msra.mxu0 %v14129_v56  ;;  %12766 = vmatprep.mubr.msk.f32.mxu0 %vm13284_vm1, %v13283_v0 }
 0xc0f   : > { %12769 = vmatprep.subr.mxu0 %v13283_v0 }
 0xc11   : > { %12762 = vmatmul.mubr.f32.vlgmr.msra.gmra.mrb[32].mxu1 %v10338_v47 }
 0xc12   : > { %12795 = vmatpush3.msra.mxu1 %v14136_v57  ;;  %12796 = vmatprep.mubr.msk.f32.mxu1 %vm13284_vm1, %v13283_v0 }
 0xc13   : > { %12799 = vmatprep.subr.mxu1 %v13283_v0 }
 0xce0   : > { %v10265_v59 = vpop.f32.mrb[32].mxu0 }
 0xce1   : > { %v10719_v60 = vsel %vm1668_vm4, %v10265_v59, 0  ;;  %v12733_v61 = vpop.f32.mrb[33].mxu0 }
 0xce2   : > { %v10787_v37 = vand.u32 4294901760, %v10719_v60 }
 0xce4   : > { %v10788_v1 = vsub.f32 %v10719_v60, %v10787_v37  ;;  %v10714_v2 = vpop.f32.mrb[32].mxu1 }
 0xce5   : > { %v11168_v3 = vsel %vm1668_vm4, %v10714_v2, 0  ;;  %v12763_v4 = vpop.f32.mrb[33].mxu1 }
 0xce6   : > { %v10789_v5 = vand.u32 4294901760, %v10788_v1  ;;  %v11236_v6 = vand.u32 4294901760, %v11168_v3 }
 0xce8   : > { %v10790_v9 = vsub.f32 %v10788_v1, %v10789_v5  ;;  %v11237_v10 = vsub.f32 %v11168_v3, %v11236_v6 }
 0xcea   : > { %v10791_v11 = vand.u32 4294901760, %v10790_v9  ;;  %v11238_v12 = vand.u32 4294901760, %v11237_v10 }
 0xcec   : > { %v11239_v15 = vsub.f32 %v11237_v10, %v11238_v12  ;;  %12767 = vmatmul.mubr.f32.vlgmr.msra.gmra.mrb[34].mxu0 %v10791_v11 }
 0xced   : > { %12770 = vmatpush3.msra.mxu0 %v10802_v13  ;;  %12771 = vmatprep.mubr.msk.f32.mxu0 %vm13284_vm1, %v13283_v0 }
 0xcee   : > { %v11240_v16 = vand.u32 4294901760, %v11239_v15  ;;  %12774 = vmatprep.subr.mxu0 %v13283_v0 }
 0xcf0   : > { %12797 = vmatmul.mubr.f32.vlgmr.msra.gmra.mrb[34].mxu1 %v11240_v16 }
 0xcf1   : > { %12800 = vmatpush3.msra.mxu1 %v11251_v17  ;;  %12801 = vmatprep.mubr.msk.f32.mxu1 %vm13284_vm1, %v13283_v0 }
 0xcf2   : > { %12804 = vmatprep.subr.mxu1 %v13283_v0 }
 0xcf4   : > { %12772 = vmatmul.mubr.f32.vlgmr.msra.gmra.mrb[34].mxu0 %v10787_v37 }
 0xcf5   : > { %12775 = vmatpush3.msra.mxu0 %v10799_v58  ;;  %12776 = vmatprep.mubr.msk.f32.mxu0 %vm13284_vm1, %v13283_v0 }
 0xcf6   : > { %12779 = vmatprep.subr.mxu0 %v13283_v0 }
 0xcf8   : > { %12802 = vmatmul.mubr.f32.vlgmr.msra.gmra.mrb[34].mxu1 %v11236_v6 }
 0xcf9   : > { %12805 = vmatpush3.msra.mxu1 %v11248_v62  ;;  %12806 = vmatprep.mubr.msk.f32.mxu1 %vm13284_vm1, %v13283_v0 }
 0xcfa   : > { %12809 = vmatprep.subr.mxu1 %v13283_v0 }
 0xcfc   : > { %12777 = vmatmul.mubr.f32.vlgmr.msra.gmra.mrb[34].mxu0 %v10788_v1 }
 0xcfd   : > { %12780 = vmatpush3.msra.mxu0 %v14129_v56  ;;  %12781 = vmatprep.mubr.msk.f32.mxu0 %vm13284_vm1, %v13283_v0 }
 0xcfe   : > { %12784 = vmatprep.subr.mxu0 %v13283_v0 }
 0xd00   : > { %12807 = vmatmul.mubr.f32.vlgmr.msra.gmra.mrb[34].mxu1 %v11237_v10 }
 0xd01   : > { %12810 = vmatpush3.msra.mxu1 %v14136_v57  ;;  %12811 = vmatprep.mubr.msk.f32.mxu1 %vm13284_vm1, %v13283_v0 }
 0xd02   : > { %12814 = vmatprep.subr.mxu1 %v13283_v0 }
 0xd04   : > { %12782 = vmatmul.mubr.f32.vlgmr.msra.gmra.mrb[34].mxu0 %v10789_v5 }
 0xd05   : > { %12785 = vmatpush3.msra.mxu0 %v10800_v63  ;;  %12786 = vmatprep.mubr.msk.f32.mxu0 %vm13284_vm1, %v13283_v0 }
 0xd06   : > { %12789 = vmatprep.subr.mxu0 %v13283_v0 }
 0xd08   : > { %12812 = vmatmul.mubr.f32.vlgmr.msra.gmra.mrb[34].mxu1 %v11238_v12 }
 0xd09   : > { %12815 = vmatpush3.msra.mxu1 %v11249_v8  ;;  %12816 = vmatprep.mubr.msk.f32.mxu1 %vm13284_vm1, %v13283_v0 }
 0xd0a   : > { %12819 = vmatprep.subr.mxu1 %v13283_v0 }
 0xd0c   : > { %12787 = vmatmul.mubr.f32.vlgmr.msra.gmra.mrb[34].mxu0 %v10787_v37 }
 0xd0d   : > { %12790 = vmatpush3.msra.mxu0 %v14129_v56  ;;  %12791 = vmatprep.mubr.msk.f32.mxu0 %vm13284_vm1, %v13283_v0 }
 0xd10   : > { %12817 = vmatmul.mubr.f32.vlgmr.msra.gmra.mrb[34].mxu1 %v11236_v6 }
 0xd11   : > { %12820 = vmatpush3.msra.mxu1 %v14136_v57  ;;  %12821 = vmatprep.mubr.msk.f32.mxu1 %vm13284_vm1, %v13283_v0 }
 0xd14   : > { %12792 = vmatmul.mubr.f32.vlgmr.msra.gmra.mrb[34].mxu0 %v10787_v37 }
 0xd18   : > { %12822 = vmatmul.mubr.f32.vlgmr.msra.gmra.mrb[34].mxu1 %v11236_v6 }
 0xde7   : > { %v11163_v18 = vpop.f32.mrb[34].mxu0 }
 0xde8   : > { %v11616_v19 = vsub.f32 %v13584_v29, %v11163_v18  ;;  %v12793_v21 = vpop.f32.mrb[35].mxu0 }
 0xdea   : > { %v11620_v22 = vmul.f32 %v11618_v20, %v11616_v19 }
 0xdeb   : > { %v11612_v23 = vpop.f32.mrb[34].mxu1 }
 0xdec   : > { %v11617_v24 = vsub.f32 %v13584_v29, %v11612_v23  ;;  %v12823_v31 = vpop.f32.mrb[35].mxu1  ;;  %v11622_v32 = vmul.f32 %v13511_v41, %v11620_v22 }
 0xdee   : > { %v11621_v33 = vmul.f32 %v11619_v25, %v11617_v24  ;;  %v11624_v0 = vsel %vm1668_vm4, %v11622_v32, 0.0 }
 0xdef   : > { %11625 = vadd.xlane.f32.xlu0 %v11624_v0 }
 0xdf0   : > { %v11623_v34 = vmul.f32 %v13511_v41, %v11621_v33 }
 0xdf2   : > { %v11627_v36 = vsel %vm1668_vm4, %v11623_v34, 0.0 }
 0xdf3   : > { %11628 = vadd.xlane.f32.xlu0 %v11627_v36 }
 0xe7c   : > { %v11626_v26 = vpop.xlane.xlu0 %11625 }
 0xe7d   : > { %v11630_v38 = vrot.slane %v11626_v26, 4 }
 0xe7f   : > { %v11631_v39 = vadd.f32 %v11630_v38, %v11626_v26 }
 0xe80   : > { %v11629_v40 = vpop.xlane.xlu0 %11628 }
 0xe81   : > { %v11632_v27 = vrot.slane %v11631_v39, 2  ;;  %v11636_v29 = vrot.slane %v11629_v40, 4 }
 0xe83   : > { %v11633_v43 = vadd.f32 %v11632_v27, %v11631_v39  ;;  %v11637_v28 = vadd.f32 %v11636_v29, %v11629_v40 }
 0xe85   : > { %v11634_v44 = vrot.slane %v11633_v43, 1  ;;  %v11638_v45 = vrot.slane %v11637_v28, 2 }
 0xe87   : > { %v11635_v47 = vadd.f32 %v11634_v44, %v11633_v43  ;;  %v11639_v48 = vadd.f32 %v11638_v45, %v11637_v28 }
 0xe89   : > { %13162 = vrsqrt.f32 %v11635_v47  ;;  %v11640_v49 = vrot.slane %v11639_v48, 1  ;;  %vm11644_vm7 = vcmp.eq.f32.partialorder %v11635_v47, inf  ;;  %v11647_v52 = vand.u32 2147483648, %v11635_v47 }
 0xe8a   : > { %vm11646_vm8 = vcmp.eq.f32.partialorder %v11635_v47, 0.0 }
 0xe8b   : > { %v11641_v50 = vadd.f32 %v11640_v49, %v11639_v48 }
 0xe8d   : > { %13164 = vrsqrt.f32 %v11641_v50  ;;  %vm11651_vm10 = vcmp.eq.f32.partialorder %v11641_v50, inf  ;;  %v11654_v56 = vand.u32 2147483648, %v11641_v50  ;;  %vm11653_vm11 = vcmp.eq.f32.partialorder %v11641_v50, 0.0 }
 0xe93   : > { %v13163_v41 = vpop.eup %13162 }
 0xe94   : > { %v11643_v51 = vmul.f32 %v13163_v41, %v11635_v47 }
 0xe96   : > { %v11645_v53 = vsel %vm11644_vm7, %v11635_v47, %v11643_v51 }
 0xe97   : > { %v11648_v30 = vsel %vm11646_vm8, %v11647_v52, %v11645_v53  ;;  %v13165_v35 = vpop.eup %13164 }
 0xe98   : > { %vm11656_vm9 = vcmp.lt.f32.partialorder %v11648_v30, 0.0  ;;  %v11658_v42 = vceil.f32 %v11648_v30  ;;  %v11660_v46 = vfloor.f32 %v11648_v30  ;;  %v11650_v54 = vmul.f32 %v13165_v35, %v11641_v50 }
 0xe9a   : > { %v11662_v55 = vsel %vm11656_vm9, %v11658_v42, %v11660_v46  ;;  %v11652_v57 = vsel %vm11651_vm10, %v11641_v50, %v11650_v54 }
 0xe9b   : > { %v11664_v58 = vmul.f32 %v11662_v55, %v11620_v22  ;;  %v11655_v59 = vsel %vm11653_vm11, %v11654_v56, %v11652_v57 }
 0xe9c   : > { %vm11657_vm12 = vcmp.lt.f32.partialorder %v11655_v59, 0.0  ;;  %v11659_v60 = vceil.f32 %v11655_v59  ;;  %v11661_v61 = vfloor.f32 %v11655_v59 }
 0xe9d   : > { %v11666_v37 = vsel %vm1668_vm4, %v11664_v58, 0.0 }
 0xe9e   : > { %v11667_v62 = vrot.slane %v11666_v37, 4  ;;  %v11663_v63 = vsel %vm11657_vm12, %v11659_v60, %v11661_v61 }
 0xe9f   : > { %v11665_v1 = vmul.f32 %v11663_v63, %v11621_v33 }
 0xea0   : > { %v11668_v2 = vadd.f32 %v11667_v62, %v11666_v37 }
 0xea1   : > { %v11673_v4 = vsel %vm1668_vm4, %v11665_v1, 0.0 }
 0xea2   : > { %v11669_v3 = vrot.slane %v11668_v2, 2  ;;  %v11674_v5 = vrot.slane %v11673_v4, 4 }
 0xea4   : > { %v11670_v6 = vadd.f32 %v11669_v3, %v11668_v2  ;;  %v11675_v7 = vadd.f32 %v11674_v5, %v11673_v4 }
 0xea6   : > { %v11671_v8 = vrot.slane %v11670_v6, 1  ;;  %v11676_v9 = vrot.slane %v11675_v7, 2 }
 0xea8   : > { %v11672_v10 = vadd.f32 %v11671_v8, %v11670_v6  ;;  %v11677_v11 = vadd.f32 %v11676_v9, %v11675_v7 }
 0xeaa   : > { %v11681_v12 = vmul.f32 0.125, %v11672_v10  ;;  %v11678_v13 = vrot.slane %v11677_v11, 1 }
 0xeac   : > { %11684 = vst.msk [vmem:[%s151_s30] sm:$0x1] %vm11683_vm13, %v11681_v12  ;;  %v11679_v14 = vadd.f32 %v11678_v13, %v11677_v11 }
 0xeae   : > { %v11682_v15 = vmul.f32 0.125, %v11679_v14 }
 0xeb0   : > { %11685 = vst.msk [vmem:[%s151_s30 + $0x1] sm:$0x1] %vm11683_vm13, %v11682_v15 }
 0xeb1   : > { %13209 = shalt.err (!%p13206_p5)
}
 0xeb2   : > { %s13210_s23 = scalar_lea.hbm %s14195_s13, 32  ;;  %s13214_s28 = scalar_lea.hbm %s14247_s1, 64 }
 0xeb3   : > { %p13211_p4 = scmp.ne.s32.totalorder %s14195_s13, %s13210_s23  ;;  %p13215_p12 = scmp.lt.u32.totalorder %s14195_s13, %s14247_s1 }
 0xeb4   : > { %p13216_p1 = scmp.lt.u32.totalorder %s13214_s28, %s13210_s23  ;;  %p13218_p8 = scmp.lt.u32.totalorder %s13210_s23, %s14195_s13 }
 0xeb5   : > { %p13212_p7 = pnand %p13211_p4, %p14257_p9 }
 0xeb6   : > { %p13217_p3 = por %p13216_p1, %p13215_p12 }
 0xeb7   : > { %p13213_p10 = pneg %p13212_p7 }
 0xeb8   : > { %p13219_p11 = por %p13218_p8, %p13217_p3 }
 0xeba   : > { %p13220_p0 = pnand %p13219_p11, %p13213_p10 }
 0xebc   : > { %13223 = shalt.err (!%p13220_p0)
}
 0xebd   : > { %s13288_s18 = smov 16   ;;  %s13289_s27 = smov 1  }
 0xebe   : > { %13090 = dma.vmem_to_hbm [thread:$0]  (%p14257_p9), %s14197_s2, 32, %s14195_s13, %s11687_s15, %s13288_s18, %s13288_s18, %s13289_s27  }
 0xebf PF: > { %s11715_s29 = sand.u32 1, %s13258_s6   ;;  %p14258_p6 = scmp.ne.s32.totalorder %s14252_s21, 0 }
 0xec0   : > { %p14259_p13 = scmp.ge.s32.totalorder %s13278_s11, 2  ;;  %s11716_s30 = scalar_lea.sflag [#allocation6], %s11715_s29 }
 0xec2   : > { %p13097_p2 = pnand %p14259_p13, %p14258_p6 }
 0xec4   : > { %13253 = dma.done.wait (!%p13097_p2), %s11716_s30, 32  }
 0xec5   : > { %13255 = vsyncadd (!%p13097_p2), %s11716_s30, 4294967264  ;;  %s17_s11 = sadd.s32 1, %s13278_s11   ;;  %s14260_s6 = smov %s13262_s7 }
 0xec6   : > { %p14_p5 = scmp.ge.s32.totalorder %s17_s11, 4   ;;  %s14261_s7 = smov %s13266_s8 }
 0xec7   : > { %s14262_s8 = smov %s13356_s20  ;;  %s14263_s9 = smov %s13274_s10 }
 0xec8   : > { %s14264_s10 = smov %s14266_s14  ;;  %16 = sbr.rel (!%p14_p5) target bundleno = 6 (0x6), region = 77 }
 0xecf   :  { %11721 = vsyncpa [#allocation5], 1 }
 0xed0   :  { %11723 = vsyncpa [#allocation5 + $0x1], 1 }
 0xed1   :  { %11724 = vsyncpa [#allocation6], 1 }
 0xed2   :  { %11726 = vsyncpa [#allocation6 + $0x1], 1 }

</bundles_post_ra>
